<compile_context>
chip_gen: v7x
topology: tpu7x:2x2x1
jax: 0.10.0
libtpu: 0.0.40
codegen_flags: <defaults>
</compile_context>

<pallas_src>
import jax
import jax.numpy as jnp
from jax.experimental import pallas as pl
from jax.experimental.pallas import tpu as pltpu


def _round_up(x, m):
    return (x + m - 1) // m * m


def _pick_tk(k_p128, tk_max):
    """Largest multiple of 128 that divides k_p128 and is <= tk_max."""
    nk = k_p128 // 128
    dmax = max(1, min(nk, tk_max // 128))
    for d in range(dmax, 0, -1):
        if nk % d == 0:
            return 128 * d
    return 128


def _box_head_kernel(x_ref, w6_ref, b6_ref, w7_ref, b7_ref, o_ref, acc_ref):
    k = pl.program_id(1)

    @pl.when(k == 0)
    def _():
        # Fold fc6 bias into the accumulator init (saves a tm x rep_p VPU add
        # in the finalize step, which already hosts the fc7 matmul + ReLUs).
        acc_ref[...] = jnp.broadcast_to(b6_ref[...], acc_ref.shape)

    # fc6 partial sum over this K tile (bf16 operands on the MXU by default,
    # f32 accumulation in VMEM scratch).
    acc_ref[...] += jnp.dot(
        x_ref[...], w6_ref[...], preferred_element_type=jnp.float32
    )

    @pl.when(k == pl.num_programs(1) - 1)
    def _():
        # Finalize fc6: ReLU (bias already folded), then fused fc7 + ReLU.
        h = jnp.maximum(acc_ref[...], 0.0)
        y = jnp.dot(
            h.astype(w7_ref.dtype), w7_ref[...], preferred_element_type=jnp.float32
        )
        y = jnp.maximum(y + b7_ref[...], 0.0)
        o_ref[...] = y.astype(o_ref.dtype)


def cascade_box_head(
    x_nchw, w6, b6, w7, b7, *, tm=512, tk_max=2048, compute_dtype=jnp.bfloat16
):
    """Pallas implementation of CascadeBoxHead.forward.

    Args:
        x_nchw: (N, C, H, W) RoI features.
        w6: (in_features, representation_size)          fc6 weight (transposed vs PyTorch).
        b6: (representation_size,)                      fc6 bias.
        w7: (representation_size, representation_size)  fc7 weight (transposed).
        b7: (representation_size,)                      fc7 bias.
        tm: max RoI rows per grid step (auto-clamped; >= 2 tiles kept when N allows).
        tk_max: upper bound on the fc6 contraction tile (actual tk divides
            round_up(in_features, 128)).
        compute_dtype: MXU operand dtype (default bf16; pass jnp.float32 for an
            all-f32 path). Accumulation is always f32; output keeps input dtype.

    Returns:
        (N, representation_size) box features.
    """
    n = x_nchw.shape[0]
    k_in = x_nchw.shape[1] * x_nchw.shape[2] * x_nchw.shape[3]
    rep = w6.shape[1]
    out_dtype = x_nchw.dtype

    # nn.Flatten: row-major flatten of (C, H, W) per sample.
    x2d = x_nchw.reshape(n, k_in)
    if compute_dtype is not None:
        x2d = x2d.astype(compute_dtype)
        w6 = w6.astype(compute_dtype)
        w7 = w7.astype(compute_dtype)
    cdtype = x2d.dtype

    # ---- Tile selection ----
    rep_p = _round_up(rep, 128)
    k_p = _round_up(k_in, 128)
    tk = _pick_tk(k_p, tk_max)  # divides k_p -> no extra K padding beyond 128-round.
    # Row tile: big (fewer HBM passes over w6) but keep >= 2 N-tiles when N
    # allows so the "parallel" grid axis can shard across v7x's 2 TensorCores.
    n_p8 = _round_up(max(n, 1), 8)
    if n_p8 <= 8:
        tm_eff = n_p8
    else:
        tm_eff = max(8, min(tm, _round_up((n + 1) // 2, 8)))
    n_p = _round_up(n, tm_eff)

    # ---- Zero padding (exact after slicing; only materialized when needed) ----
    # NOTE: x must be zero-padded along K whenever k_in % 128 != 0 (never rely
    # on zero rows of w6 to mask garbage: NaN * 0 = NaN).
    if n_p != n or k_p != k_in:
        x2d = jnp.pad(x2d, ((0, n_p - n), (0, k_p - k_in)))
    # Weights/biases are static parameters; these pads are no-ops when the
    # dims are already 128-aligned and get hoisted/constant-folded under jit.
    if k_p != k_in or rep_p != rep:
        w6 = jnp.pad(w6, ((0, k_p - k_in), (0, rep_p - rep)))
    if rep_p != rep:
        w7 = jnp.pad(w7, ((0, rep_p - rep), (0, rep_p - rep)))
    b6_p = jnp.pad(b6.astype(jnp.float32), (0, rep_p - rep)).reshape(1, rep_p)
    b7_p = jnp.pad(b7.astype(jnp.float32), (0, rep_p - rep)).reshape(1, rep_p)

    grid = (n_p // tm_eff, k_p // tk)

    # ---- VMEM budget: double-buffered x/w6 streams, single-buffered resident
    # w7, double-buffered output, f32 accumulator + biases. Cap at 56 MiB so
    # the same tiles stay safe on v7x (64 MiB physical). ----
    cb = jnp.dtype(cdtype).itemsize
    ob = jnp.dtype(out_dtype).itemsize
    est = (
        2 * tm_eff * tk * cb          # x tiles
        + 2 * tk * rep_p * cb         # w6 tiles
        + rep_p * rep_p * cb          # w7 (resident, single-buffered)
        + 2 * tm_eff * rep_p * ob     # output tiles
        + tm_eff * rep_p * 4          # f32 accumulator
        + 4 * rep_p * 4               # biases
    )
    vmem_limit = int(min(56 * 2 ** 20, max(int(est * 1.5), 32 * 2 ** 20)))

    def build(single_buffer_resident):
        resident = (
            dict(pipeline_mode=pl.Buffered(1)) if single_buffer_resident else {}
        )
        return pl.pallas_call(
            _box_head_kernel,
            out_shape=jax.ShapeDtypeStruct((n_p, rep_p), out_dtype),
            grid_spec=pltpu.PrefetchScalarGridSpec(
                num_scalar_prefetch=0,
                grid=grid,
                in_specs=[
                    pl.BlockSpec((tm_eff, tk), lambda i, k: (i, k)),        # x tile
                    pl.BlockSpec((tk, rep_p), lambda i, k: (k, 0)),         # w6 K-tile
                    pl.BlockSpec((1, rep_p), lambda i, k: (0, 0), **resident),      # b6
                    pl.BlockSpec((rep_p, rep_p), lambda i, k: (0, 0), **resident),  # w7
                    pl.BlockSpec((1, rep_p), lambda i, k: (0, 0), **resident),      # b7
                ],
                out_specs=pl.BlockSpec((tm_eff, rep_p), lambda i, k: (i, 0)),
                scratch_shapes=[pltpu.VMEM((tm_eff, rep_p), jnp.float32)],
            ),
            compiler_params=pltpu.CompilerParams(
                dimension_semantics=("parallel", "arbitrary"),
                vmem_limit_bytes=vmem_limit,
            ),
        )

    try:
        out = build(True)(x2d, w6, b6_p, w7, b7_p)
    except Exception:
        # Fallback if this jax version rejects buffer_count=1; with a constant
        # index map the default pipeline still only DMAs these operands once.
        out = build(False)(x2d, w6, b6_p, w7, b7_p)

    return out[:n, :rep]


def _kaiming_uniform_a1(key, fan_in, fan_out, dtype=jnp.float32):
    # nn.init.kaiming_uniform_(w, a=1): bound = sqrt(6 / ((1 + a^2) * fan_in))
    #                                         = sqrt(3 / fan_in)
    bound = (3.0 / fan_in) ** 0.5
    # PyTorch weight is (out_features, in_features); we store its transpose.
    return jax.random.uniform(
        key, (fan_in, fan_out), dtype=dtype, minval=-bound, maxval=bound
    )


def _reference(x_nchw, w6, b6, w7, b7):
    n = x_nchw.shape[0]
    x2d = x_nchw.reshape(n, -1)
    h = jnp.maximum(x2d @ w6 + b6[None, :], 0.0)
    return jnp.maximum(h @ w7 + b7[None, :], 0.0)


if __name__ == "__main__":
    # Small shapes consistent with the module:
    # in_channels=4, roi_size=(16,16) -> in_features=1024,
    # representation_size=32, batch (num RoIs) = 2.
    N, C, H, W = 2, 4, 16, 16
    REP = 32
    IN_FEATURES = C * H * W

    key = jax.random.PRNGKey(0)
    kx, k6, k7 = jax.random.split(key, 3)

    x = jax.random.normal(kx, (N, C, H, W), dtype=jnp.float32)
    w6 = _kaiming_uniform_a1(k6, IN_FEATURES, REP)
    b6 = jnp.zeros((REP,), dtype=jnp.float32)      # nn.init.constant_(bias, 0)
    w7 = _kaiming_uniform_a1(k7, REP, REP)
    b7 = jnp.zeros((REP,), dtype=jnp.float32)

    ref = _reference(x, w6, b6, w7, b7)

    # f32 operand path with tk_max=512 -> two K-steps (exercises the
    # bias-folded accumulator across K tiles); tight tolerance.
    out_f32 = cascade_box_head(
        x, w6, b6, w7, b7, compute_dtype=jnp.float32, tk_max=512
    )
    out_f32 = jax.block_until_ready(out_f32)
    assert out_f32.shape == (N, REP)
    assert jnp.allclose(out_f32, ref, atol=1e-3, rtol=1e-3), "f32 mismatch vs reference"

    # Default bf16 MXU path (single K-step at this size); loose tolerance
    # (bf16 operands, f32 accumulation).
    out_bf16 = cascade_box_head(x, w6, b6, w7, b7)
    out_bf16 = jax.block_until_ready(out_bf16)
    assert out_bf16.shape == (N, REP)
    assert jnp.allclose(out_bf16.astype(jnp.float32), ref, atol=1e-1, rtol=1e-1), (
        "bf16 mismatch vs reference"
    )

    print("KERNEL_OK")
</pallas_src>

<mosaic_0001>
module attributes {stable_mosaic.version = 11 : i64} {
  func.func @_box_head_kernel(%arg0: i32, %arg1: i32, %arg2: memref<8x512xf32, #tpu.memory_space<vmem>>, %arg3: memref<512x128xf32, #tpu.memory_space<vmem>>, %arg4: memref<1x128xf32, #tpu.memory_space<vmem>>, %arg5: memref<128x128xf32, #tpu.memory_space<vmem>>, %arg6: memref<1x128xf32, #tpu.memory_space<vmem>>, %arg7: memref<8x128xf32, #tpu.memory_space<vmem>>, %arg8: memref<8x128xf32, #tpu.memory_space<vmem>>) attributes {dimension_semantics = [#tpu.dimension_semantics<parallel>, #tpu.dimension_semantics<arbitrary>], iteration_bounds = array<i64: 1, 2>, scalar_prefetch = 0 : i64, scratch_operands = 1 : i64, tpu.core_type = #tpu.core_type<tc>, window_params = [{transform_indices = @transform_0, window_bounds = array<i64: 8, 512>}, {transform_indices = @transform_1, window_bounds = array<i64: 512, 128>}, {pipeline_mode = #tpu.pipeline_mode<synchronous>, transform_indices = @transform_2, window_bounds = array<i64: 1, 128>}, {pipeline_mode = #tpu.pipeline_mode<synchronous>, transform_indices = @transform_3, window_bounds = array<i64: 128, 128>}, {pipeline_mode = #tpu.pipeline_mode<synchronous>, transform_indices = @transform_4, window_bounds = array<i64: 1, 128>}, {transform_indices = @transform_5, window_bounds = array<i64: 8, 128>}]} {
    %c0_i32 = arith.constant 0 : i32
    %0 = arith.cmpi eq, %arg1, %c0_i32 : i32
    %1 = arith.extui %0 : i1 to i32
    %c0_i32_0 = arith.constant 0 : i32
    %2 = arith.cmpi ne, %1, %c0_i32_0 : i32
    scf.if %2 {
      %c0_9 = arith.constant 0 : index
      %c0_10 = arith.constant 0 : index
      %12 = vector.load %arg4[%c0_9, %c0_10] : memref<1x128xf32, #tpu.memory_space<vmem>>, vector<1x128xf32>
      %13 = vector.shape_cast %12 : vector<1x128xf32> to vector<1x128xf32>
      %14 = vector.broadcast %13 : vector<1x128xf32> to vector<8x128xf32>
      %c0_11 = arith.constant 0 : index
      %c0_12 = arith.constant 0 : index
      %15 = vector.load %arg8[%c0_11, %c0_12] : memref<8x128xf32, #tpu.memory_space<vmem>>, vector<8x128xf32>
      tpu.vector_store %arg8[%c0_11, %c0_12], %14 {strides = array<i32>} : memref<8x128xf32, #tpu.memory_space<vmem>>, vector<8x128xf32>,
    } else {
    }
    %c0 = arith.constant 0 : index
    %c0_1 = arith.constant 0 : index
    %3 = vector.load %arg8[%c0, %c0_1] : memref<8x128xf32, #tpu.memory_space<vmem>>, vector<8x128xf32>
    %c0_2 = arith.constant 0 : index
    %c0_3 = arith.constant 0 : index
    %4 = vector.load %arg2[%c0_2, %c0_3] : memref<8x512xf32, #tpu.memory_space<vmem>>, vector<8x512xf32>
    %c0_4 = arith.constant 0 : index
    %c0_5 = arith.constant 0 : index
    %5 = vector.load %arg3[%c0_4, %c0_5] : memref<512x128xf32, #tpu.memory_space<vmem>>, vector<512x128xf32>
    %cst = arith.constant dense<0.000000e+00> : vector<8x128xf32>
    %6 = tpu.matmul %4, %5, %cst {dimension_numbers = #tpu.dot_dimension_numbers<[1], [0], [0], [1], [0, 0, 1, 1], [], []>} : vector<8x512xf32>, vector<512x128xf32>, vector<8x128xf32> -> vector<8x128xf32>
    %7 = arith.addf %3, %6 : vector<8x128xf32>
    %c0_6 = arith.constant 0 : index
    %c0_7 = arith.constant 0 : index
    %8 = vector.load %arg8[%c0_6, %c0_7] : memref<8x128xf32, #tpu.memory_space<vmem>>, vector<8x128xf32>
    tpu.vector_store %arg8[%c0_6, %c0_7], %7 {strides = array<i32>} : memref<8x128xf32, #tpu.memory_space<vmem>>, vector<8x128xf32>,
    %c1_i32 = arith.constant 1 : i32
    %9 = arith.cmpi eq, %arg1, %c1_i32 : i32
    %10 = arith.extui %9 : i1 to i32
    %c0_i32_8 = arith.constant 0 : i32
    %11 = arith.cmpi ne, %10, %c0_i32_8 : i32
    scf.if %11 {
      %c0_9 = arith.constant 0 : index
      %c0_10 = arith.constant 0 : index
      %12 = vector.load %arg8[%c0_9, %c0_10] : memref<8x128xf32, #tpu.memory_space<vmem>>, vector<8x128xf32>
      %cst_11 = arith.constant 0.000000e+00 : f32
      %13 = vector.broadcast %cst_11 : f32 to vector<8x128xf32>
      %14 = arith.maximumf %12, %13 : vector<8x128xf32>
      %c0_12 = arith.constant 0 : index
      %c0_13 = arith.constant 0 : index
      %15 = vector.load %arg5[%c0_12, %c0_13] : memref<128x128xf32, #tpu.memory_space<vmem>>, vector<128x128xf32>
      %cst_14 = arith.constant dense<0.000000e+00> : vector<8x128xf32>
      %16 = tpu.matmul %14, %15, %cst_14 {dimension_numbers = #tpu.dot_dimension_numbers<[1], [0], [0], [1], [0, 0, 1, 1], [], []>} : vector<8x128xf32>, vector<128x128xf32>, vector<8x128xf32> -> vector<8x128xf32>
      %c0_15 = arith.constant 0 : index
      %c0_16 = arith.constant 0 : index
      %17 = vector.load %arg6[%c0_15, %c0_16] : memref<1x128xf32, #tpu.memory_space<vmem>>, vector<1x128xf32>
      %18 = vector.broadcast %17 : vector<1x128xf32> to vector<8x128xf32>
      %19 = arith.addf %16, %18 : vector<8x128xf32>
      %cst_17 = arith.constant 0.000000e+00 : f32
      %20 = vector.broadcast %cst_17 : f32 to vector<8x128xf32>
      %21 = arith.maximumf %19, %20 : vector<8x128xf32>
      %c0_18 = arith.constant 0 : index
      %c0_19 = arith.constant 0 : index
      %22 = vector.load %arg7[%c0_18, %c0_19] : memref<8x128xf32, #tpu.memory_space<vmem>>, vector<8x128xf32>
      tpu.vector_store %arg7[%c0_18, %c0_19], %21 {strides = array<i32>} : memref<8x128xf32, #tpu.memory_space<vmem>>, vector<8x128xf32>,
    } else {
    }
    return
  }
  func.func @transform_0(%arg0: i32, %arg1: i32) -> (i32, i32) {
    %c0_i32 = arith.constant 0 : i32
    return %arg0, %arg1 : i32, i32
  }
  func.func @transform_1(%arg0: i32, %arg1: i32) -> (i32, i32) {
    %c0_i32 = arith.constant 0 : i32
    %c0_i32_0 = arith.constant 0 : i32
    return %arg1, %c0_i32 : i32, i32
  }
  func.func @transform_2(%arg0: i32, %arg1: i32) -> (i32, i32) {
    %c0_i32 = arith.constant 0 : i32
    %c0_i32_0 = arith.constant 0 : i32
    %c0_i32_1 = arith.constant 0 : i32
    return %c0_i32, %c0_i32_0 : i32, i32
  }
  func.func @transform_3(%arg0: i32, %arg1: i32) -> (i32, i32) {
    %c0_i32 = arith.constant 0 : i32
    %c0_i32_0 = arith.constant 0 : i32
    %c0_i32_1 = arith.constant 0 : i32
    return %c0_i32, %c0_i32_0 : i32, i32
  }
  func.func @transform_4(%arg0: i32, %arg1: i32) -> (i32, i32) {
    %c0_i32 = arith.constant 0 : i32
    %c0_i32_0 = arith.constant 0 : i32
    %c0_i32_1 = arith.constant 0 : i32
    return %c0_i32, %c0_i32_0 : i32, i32
  }
  func.func @transform_5(%arg0: i32, %arg1: i32) -> (i32, i32) {
    %c0_i32 = arith.constant 0 : i32
    %c0_i32_0 = arith.constant 0 : i32
    return %arg0, %c0_i32 : i32, i32
  }
}

module attributes {stable_mosaic.version = 11 : i64} {
  func.func @_box_head_kernel(%arg0: i32, %arg1: i32, %arg2: memref<8x512xf32, #tpu.memory_space<vmem>>, %arg3: memref<512x128xf32, #tpu.memory_space<vmem>>, %arg4: memref<1x128xf32, #tpu.memory_space<vmem>>, %arg5: memref<128x128xf32, #tpu.memory_space<vmem>>, %arg6: memref<1x128xf32, #tpu.memory_space<vmem>>, %arg7: memref<8x128xf32, #tpu.memory_space<vmem>>, %arg8: memref<8x128xf32, #tpu.memory_space<vmem>>) attributes {dimension_semantics = [#tpu.dimension_semantics<parallel>, #tpu.dimension_semantics<arbitrary>], iteration_bounds = array<i64: 1, 2>, scalar_prefetch = 0 : i64, scratch_operands = 1 : i64, tpu.core_type = #tpu.core_type<tc>, window_params = [{transform_indices = @transform_0, window_bounds = array<i64: 8, 512>}, {transform_indices = @transform_1, window_bounds = array<i64: 512, 128>}, {pipeline_mode = #tpu.pipeline_mode<synchronous>, transform_indices = @transform_2, window_bounds = array<i64: 1, 128>}, {pipeline_mode = #tpu.pipeline_mode<synchronous>, transform_indices = @transform_3, window_bounds = array<i64: 128, 128>}, {pipeline_mode = #tpu.pipeline_mode<synchronous>, transform_indices = @transform_4, window_bounds = array<i64: 1, 128>}, {transform_indices = @transform_5, window_bounds = array<i64: 8, 128>}]} {
    %c0_i32 = arith.constant 0 : i32
    %0 = arith.cmpi eq, %arg1, %c0_i32 : i32
    %1 = arith.extui %0 : i1 to i32
    %c0_i32_0 = arith.constant 0 : i32
    %2 = arith.cmpi ne, %1, %c0_i32_0 : i32
    scf.if %2 {
      %c0_9 = arith.constant 0 : index
      %c0_10 = arith.constant 0 : index
      %12 = vector.load %arg4[%c0_9, %c0_10] : memref<1x128xf32, #tpu.memory_space<vmem>>, vector<1x128xf32>
      %13 = vector.shape_cast %12 : vector<1x128xf32> to vector<1x128xf32>
      %14 = vector.broadcast %13 : vector<1x128xf32> to vector<8x128xf32>
      %c0_11 = arith.constant 0 : index
      %c0_12 = arith.constant 0 : index
      %15 = vector.load %arg8[%c0_11, %c0_12] : memref<8x128xf32, #tpu.memory_space<vmem>>, vector<8x128xf32>
      tpu.vector_store %arg8[%c0_11, %c0_12], %14 {strides = array<i32>} : memref<8x128xf32, #tpu.memory_space<vmem>>, vector<8x128xf32>,
    } else {
    }
    %c0 = arith.constant 0 : index
    %c0_1 = arith.constant 0 : index
    %3 = vector.load %arg8[%c0, %c0_1] : memref<8x128xf32, #tpu.memory_space<vmem>>, vector<8x128xf32>
    %c0_2 = arith.constant 0 : index
    %c0_3 = arith.constant 0 : index
    %4 = vector.load %arg2[%c0_2, %c0_3] : memref<8x512xf32, #tpu.memory_space<vmem>>, vector<8x512xf32>
    %c0_4 = arith.constant 0 : index
    %c0_5 = arith.constant 0 : index
    %5 = vector.load %arg3[%c0_4, %c0_5] : memref<512x128xf32, #tpu.memory_space<vmem>>, vector<512x128xf32>
    %cst = arith.constant dense<0.000000e+00> : vector<8x128xf32>
    %6 = tpu.matmul %4, %5, %cst {dimension_numbers = #tpu.dot_dimension_numbers<[1], [0], [0], [1], [0, 0, 1, 1], [], []>} : vector<8x512xf32>, vector<512x128xf32>, vector<8x128xf32> -> vector<8x128xf32>
    %7 = arith.addf %3, %6 : vector<8x128xf32>
    %c0_6 = arith.constant 0 : index
    %c0_7 = arith.constant 0 : index
    %8 = vector.load %arg8[%c0_6, %c0_7] : memref<8x128xf32, #tpu.memory_space<vmem>>, vector<8x128xf32>
    tpu.vector_store %arg8[%c0_6, %c0_7], %7 {strides = array<i32>} : memref<8x128xf32, #tpu.memory_space<vmem>>, vector<8x128xf32>,
    %c1_i32 = arith.constant 1 : i32
    %9 = arith.cmpi eq, %arg1, %c1_i32 : i32
    %10 = arith.extui %9 : i1 to i32
    %c0_i32_8 = arith.constant 0 : i32
    %11 = arith.cmpi ne, %10, %c0_i32_8 : i32
    scf.if %11 {
      %c0_9 = arith.constant 0 : index
      %c0_10 = arith.constant 0 : index
      %12 = vector.load %arg8[%c0_9, %c0_10] : memref<8x128xf32, #tpu.memory_space<vmem>>, vector<8x128xf32>
      %cst_11 = arith.constant 0.000000e+00 : f32
      %13 = vector.broadcast %cst_11 : f32 to vector<8x128xf32>
      %14 = arith.maximumf %12, %13 : vector<8x128xf32>
      %c0_12 = arith.constant 0 : index
      %c0_13 = arith.constant 0 : index
      %15 = vector.load %arg5[%c0_12, %c0_13] : memref<128x128xf32, #tpu.memory_space<vmem>>, vector<128x128xf32>
      %cst_14 = arith.constant dense<0.000000e+00> : vector<8x128xf32>
      %16 = tpu.matmul %14, %15, %cst_14 {dimension_numbers = #tpu.dot_dimension_numbers<[1], [0], [0], [1], [0, 0, 1, 1], [], []>} : vector<8x128xf32>, vector<128x128xf32>, vector<8x128xf32> -> vector<8x128xf32>
      %c0_15 = arith.constant 0 : index
      %c0_16 = arith.constant 0 : index
      %17 = vector.load %arg6[%c0_15, %c0_16] : memref<1x128xf32, #tpu.memory_space<vmem>>, vector<1x128xf32>
      %18 = vector.broadcast %17 : vector<1x128xf32> to vector<8x128xf32>
      %19 = arith.addf %16, %18 : vector<8x128xf32>
      %cst_17 = arith.constant 0.000000e+00 : f32
      %20 = vector.broadcast %cst_17 : f32 to vector<8x128xf32>
      %21 = arith.maximumf %19, %20 : vector<8x128xf32>
      %c0_18 = arith.constant 0 : index
      %c0_19 = arith.constant 0 : index
      %22 = vector.load %arg7[%c0_18, %c0_19] : memref<8x128xf32, #tpu.memory_space<vmem>>, vector<8x128xf32>
      tpu.vector_store %arg7[%c0_18, %c0_19], %21 {strides = array<i32>} : memref<8x128xf32, #tpu.memory_space<vmem>>, vector<8x128xf32>,
    } else {
    }
    return
  }
  func.func @transform_0(%arg0: i32, %arg1: i32) -> (i32, i32) {
    %c0_i32 = arith.constant 0 : i32
    return %arg0, %arg1 : i32, i32
  }
  func.func @transform_1(%arg0: i32, %arg1: i32) -> (i32, i32) {
    %c0_i32 = arith.constant 0 : i32
    %c0_i32_0 = arith.constant 0 : i32
    return %arg1, %c0_i32 : i32, i32
  }
  func.func @transform_2(%arg0: i32, %arg1: i32) -> (i32, i32) {
    %c0_i32 = arith.constant 0 : i32
    %c0_i32_0 = arith.constant 0 : i32
    %c0_i32_1 = arith.constant 0 : i32
    return %c0_i32, %c0_i32_0 : i32, i32
  }
  func.func @transform_3(%arg0: i32, %arg1: i32) -> (i32, i32) {
    %c0_i32 = arith.constant 0 : i32
    %c0_i32_0 = arith.constant 0 : i32
    %c0_i32_1 = arith.constant 0 : i32
    return %c0_i32, %c0_i32_0 : i32, i32
  }
  func.func @transform_4(%arg0: i32, %arg1: i32) -> (i32, i32) {
    %c0_i32 = arith.constant 0 : i32
    %c0_i32_0 = arith.constant 0 : i32
    %c0_i32_1 = arith.constant 0 : i32
    return %c0_i32, %c0_i32_0 : i32, i32
  }
  func.func @transform_5(%arg0: i32, %arg1: i32) -> (i32, i32) {
    %c0_i32 = arith.constant 0 : i32
    %c0_i32_0 = arith.constant 0 : i32
    return %arg0, %c0_i32 : i32, i32
  }
}

</mosaic_0001>

<bundles_post_ra>
// kernel: tpu_custom_call.1
= control target key start
LH: loop header
LB: loop body
LE: loop exit
PB: predicated region body
PF: predicated region fallthrough
CT: control target
= control target key end

     0   :  { %10 = vsyncpa [#allocation4], 0  ;;  %s1574_s0 = inlined_call_operand.hbm [shape: f32[8,1024], index: 0, kind: input, shape index: {}]   ;;  %s1575_s1 = inlined_call_operand.hbm [shape: f32[1024,128], index: 1, kind: input, shape index: {}]   ;;  %s1576_s2 = inlined_call_operand.vmem [shape: f32[1,128], index: 2, kind: input, shape index: {}]   ;;  %s1577_s3 = inlined_call_operand.hbm [shape: f32[128,128], index: 3, kind: input, shape index: {}]   ;;  %s1578_s4 = inlined_call_operand.vmem [shape: f32[1,128], index: 4, kind: input, shape index: {}]   ;;  %s1579_s5 = inlined_call_operand.hbm [shape: f32[8,128], index: 5, kind: output, shape index: {}]  }
   0x1   :  { %12 = vsyncpa [#allocation4 + $0x1], 0 }
   0x2   :  { %13 = vsyncpa [#allocation7], 0 }
   0x3   :  { %15 = vsyncpa [#allocation7 + $0x1], 0 }
   0x4   :  { %16 = vsyncpa [#allocation5], 0  ;;  %s1269_s18 = smov 0   ;;  %s1271_s19 = smov 0  }
   0x5   :  { %s1273_s20 = smov 0   ;;  %s1275_s21 = smov 0  }
   0x6   :  { %s1277_s22 = smov 0   ;;  %s1279_s23 = smov 0  }
   0x7 LB: > { %s1298_s24 = sadd.s32 4294967295, %s1228_s23   ;;  %p56_p0 = scmp.ne.s32.totalorder %s1212_s19, %s1208_s18  ;;  %s1228_s23 = sphi %s1279_s23, %s22_s23   ;;  %s1224_s22 = sphi %s1277_s22, %s1599_s22   ;;  %s1220_s21 = sphi %s1275_s21, %s1598_s21   ;;  %s1216_s20 = sphi %s1273_s20, %s1597_s20   ;;  %s1212_s19 = sphi %s1271_s19, %s1596_s19   ;;  %s1208_s18 = sphi %s1269_s18, %s1595_s18  }
   0x8   : > { %p1580_p1 = scmp.eq.s32.totalorder %s1298_s24, 0  ;;  %p736_p2 = scmp.ge.s32.totalorder %s1228_s23, 1 }
   0x9   : > { %p182_p3 = scmp.lt.s32.totalorder %s1228_s23, 3  ;;  %s1230_s27 = smov [#allocation8]  }
   0xa   : > { %p1306_p4 = por %p1580_p1, %p56_p0  ;;  %s197_s28 = sshll.u32 %s1230_s27, 4  ;;  %s198_s28 = int_to_ptr.vmem [resolvable:$true] %s197_s28 }
   0xb   : > { %p1310_p5 = pnand %p736_p2, %p182_p3  ;;  %s31_s30 = sadd.s32 1, %s1224_s22 }
   0xc   : > { %s1585_s25 = scalar_select %p1306_p4, 1, 0 }
   0xd   : > { %s1586_s26 = scalar_select %p1310_p5, 1, 0 }
   0xe   : > { %p981_p6 = pneg %p1310_p5  ;;  %s1052_s8 = scalar_lea.hbm %s1577_s3, 2048 }
   0xf   : > { %p1053_p8 = scmp.ne.s32.totalorder %s1577_s3, %s1052_s8  ;;  %p1059_p12 = scmp.lt.u32.totalorder %s1052_s8, %s1577_s3 }
  0x10   : > { %p1318_p7 = pnand %p981_p6, %p1580_p1 }
  0x12   : > { %p1054_p9 = pneg %p1318_p7 }
  0x14   : > { %p1055_p10 = pnand %p1054_p9, %p1053_p8 }
  0x16   : > { %p1056_p11 = pneg %p1055_p10 }
  0x18   : > { %p1061_p13 = pnand %p1059_p12, %p1056_p11 }
  0x1a   : > { %1064 = shalt.err (!%p1061_p13)
}
  0x1b   : > { %s1065_s13 = scalar_lea.vmem %s198_s28, 2048  ;;  %p1073_p6 = scmp.lt.s32.totalorder %s198_s28, %s198_s28 }
  0x1c   : > { %p1066_p0 = scmp.ne.s32.totalorder %s198_s28, %s1065_s13  ;;  %p1074_p1 = scmp.lt.s32.totalorder %s1065_s13, %s1065_s13 }
  0x1e   : > { %p1068_p2 = pnand %p1066_p0, %p1054_p9  ;;  %p1075_p4 = por %p1074_p1, %p1073_p6 }
  0x20   : > { %p1069_p3 = pneg %p1068_p2 }
  0x22   : > { %p1076_p5 = pnand %p1075_p4, %p1069_p3 }
  0x24   : > { %1079 = shalt.err (!%p1076_p5)
}
  0x25   : > { %s1583_s14 = smov 128   ;;  %s1584_s15 = smov 8  }
  0x26   : > { %984 = dma.hbm_to_vmem [thread:$0]  (!%p1318_p7), %s1577_s3, 2048, %s198_s28, [#allocation7], %s1583_s14, %s1583_s14, %s1584_s15  }
  0x27   : > { %p32_p1 = scmp.ge.s32.totalorder %s31_s30, 2  ;;  %s43_s18 = sadd.s32 1, %s1216_s20 }
  0x28   : > { %p50_p4 = scmp.ne.s32.totalorder %s1216_s20, %s1212_s19  ;;  %p51_p5 = scmp.eq.s32.totalorder %s1228_s23, 0 }
  0x29   : > { %s1601_s30 = smov (%p32_p1, %s31_s30), 0  ;;  %p993_p9 = scmp.lt.s32.totalorder %s1228_s23, 2 }
  0x2a   : > { %p52_p8 = por %p51_p5, %p50_p4  ;;  %s39_s27 = ssub.s32 %s1224_s22, %s1601_s30 }
  0x2b   : > { %s1352_s6 = sand.u32 1, %s1216_s20   ;;  %p41_p10 = scmp.eq.s32.totalorder %s39_s27, 0 }
  0x2c   : > { %s739_s29 = sshll.u32 %s1352_s6, 5  ;;  %s757_s7 = sshll.u32 %s1224_s22, 9 }
  0x2d   : > { %s1357_s8 = scalar_select %p41_p10, %s1216_s20, %s43_s18  }
  0x2e   : > { %s1362_s10 = scalar_lea.hbm %s1574_s0, %s757_s7  ;;  %s218_s11 = scalar_lea.vmem [#allocation3], %s739_s29 }
  0x2f   : > { %s228_s12 = sshll.u32 %s218_s11, 4  ;;  %p1364_p7 = pnand %p993_p9, %p52_p8  ;;  %s1368_s12 = int_to_ptr.vmem [resolvable:$true] %s228_s12 }
  0x30   : > { %s742_s16 = sshll.u32 %s1352_s6, 9  ;;  %s215_s17 = scalar_lea.sflag [#allocation4], %s1352_s6 }
  0x31   : > { %s1080_s18 = scalar_lea.hbm %s1362_s10, 512  ;;  %p1082_p12 = pneg %p1364_p7 }
  0x32   : > { %p1081_p11 = scmp.ne.s32.totalorder %s1362_s10, %s1080_s18  ;;  %s1085_s7 = scalar_lea.hbm %s1574_s0, 1024 }
  0x33   : > { %p1086_p2 = scmp.lt.u32.totalorder %s1362_s10, %s1574_s0  ;;  %p1087_p3 = scmp.lt.u32.totalorder %s1085_s7, %s1080_s18 }
  0x34   : > { %p1083_p13 = pnand %p1082_p12, %p1081_p11  ;;  %p1089_p1 = scmp.lt.u32.totalorder %s1080_s18, %s1362_s10 }
  0x35   : > { %p1088_p6 = por %p1087_p3, %p1086_p2 }
  0x36   : > { %p1084_p0 = pneg %p1083_p13 }
  0x37   : > { %p1090_p4 = por %p1089_p1, %p1088_p6 }
  0x39   : > { %p1091_p5 = pnand %p1090_p4, %p1084_p0 }
  0x3b   : > { %1094 = shalt.err (!%p1091_p5)
}
  0x3c   : > { %s1095_s11 = scalar_lea.vmem %s1368_s12, 512  ;;  %s1233_s27 = smov [#allocation3]  }
  0x3d   : > { %p1096_p8 = scmp.ne.s32.totalorder %s1368_s12, %s1095_s11  ;;  %s1100_s29 = sshll.u32 %s1233_s27, 4  ;;  %s1101_s29 = int_to_ptr.vmem [resolvable:$false] %s1100_s29 }
  0x3e   : > { %s1102_s28 = scalar_lea.vmem %s1101_s29, 1024  ;;  %p1103_p11 = scmp.lt.s32.totalorder %s1368_s12, %s1101_s29 }
  0x3f   : > { %p1098_p9 = pnand %p1096_p8, %p1082_p12  ;;  %p1104_p13 = scmp.lt.s32.totalorder %s1102_s28, %s1095_s11 }
  0x41   : > { %p1099_p10 = pneg %p1098_p9  ;;  %p1105_p2 = por %p1104_p13, %p1103_p11 }
  0x43   : > { %p1106_p3 = pnand %p1105_p2, %p1099_p10 }
  0x45   : > { %1109 = shalt.err (!%p1106_p3)
}
  0x46   : > { %988 = dma.hbm_to_vmem [thread:$0]  (!%p1364_p7), %s1362_s10, 512, %s1368_s12, %s215_s17  }
  0x47   : > { %s758_s18 = sshll.u32 %s1224_s22, 13  ;;  %s239_s7 = scalar_lea.vmem [#allocation6], %s742_s16 }
  0x48   : > { %s246_s9 = sshll.u32 %s239_s7, 4  ;;  %s235_s27 = sand.u32 1, %s1228_s23   ;;  %s1400_s9 = int_to_ptr.vmem [resolvable:$true] %s246_s9 }
  0x49   : > { %s1406_s28 = scalar_lea.hbm %s1575_s1, %s758_s18  ;;  %s1408_s14 = scalar_lea.sflag [#allocation7], %s235_s27 }
  0x4a   : > { %s1110_s15 = scalar_lea.hbm %s1406_s28, 8192  ;;  %s1115_s12 = scalar_lea.hbm %s1575_s1, 16384 }
  0x4b   : > { %p1111_p0 = scmp.ne.s32.totalorder %s1406_s28, %s1110_s15  ;;  %p1116_p4 = scmp.lt.u32.totalorder %s1406_s28, %s1575_s1 }
  0x4c   : > { %p1117_p5 = scmp.lt.u32.totalorder %s1115_s12, %s1110_s15  ;;  %p1119_p9 = scmp.lt.u32.totalorder %s1110_s15, %s1406_s28 }
  0x4d   : > { %p1113_p6 = pnand %p1111_p0, %p1082_p12 }
  0x4e   : > { %p1118_p8 = por %p1117_p5, %p1116_p4 }
  0x4f   : > { %p1114_p1 = pneg %p1113_p6 }
  0x50   : > { %p1120_p10 = por %p1119_p9, %p1118_p8 }
  0x52   : > { %p1121_p11 = pnand %p1120_p10, %p1114_p1 }
  0x54   : > { %1124 = shalt.err (!%p1121_p11)
}
  0x55   : > { %s1125_s18 = scalar_lea.vmem %s1400_s9, 8192  ;;  %s1234_s7 = smov [#allocation6]  }
  0x56   : > { %p1126_p13 = scmp.ne.s32.totalorder %s1400_s9, %s1125_s18  ;;  %s1130_s27 = sshll.u32 %s1234_s7, 4  ;;  %s1131_s27 = int_to_ptr.vmem [resolvable:$false] %s1130_s27 }
  0x57   : > { %s1132_s11 = scalar_lea.vmem %s1131_s27, 16384  ;;  %p1133_p0 = scmp.lt.s32.totalorder %s1400_s9, %s1131_s27 }
  0x58   : > { %p1128_p2 = pnand %p1126_p13, %p1082_p12  ;;  %p1134_p6 = scmp.lt.s32.totalorder %s1132_s11, %s1125_s18 }
  0x5a   : > { %p1129_p3 = pneg %p1128_p2  ;;  %p1135_p4 = por %p1134_p6, %p1133_p0 }
  0x5c   : > { %p1136_p5 = pnand %p1135_p4, %p1129_p3 }
  0x5e   : > { %1139 = shalt.err (!%p1136_p5)
}
  0x5f   : > { %s1589_s15 = smov 8   ;;  %s1590_s29 = smov 128  }
  0x60   : > { %991 = dma.hbm_to_vmem [thread:$0]  (!%p1364_p7), %s1406_s28, 8192, %s1400_s9, %s1408_s14, %s1590_s29, %s1590_s29, %s1589_s15  }
  0x61   : > { %p1591_p12 = scmp.ne.s32.totalorder %s1586_s26, 0 }
  0x62   : > { %s260_s6 = sand.u32 (!%p1591_p12), 1, %s1212_s19   ;;  %p1592_p1 = scmp.ne.s32.totalorder (!%p1591_p12), %s1585_s25, 0 }
  0x63   : > { %258 = sbr.rel (%p1591_p12) target bundleno = 630 (0x276), region = 40  ;;  %s746_s10 = sshll.u32 (!%p1591_p12), %s260_s6, 5 }
  0x64   : > { %s261_s12 = scalar_lea.sflag (!%p1591_p12), [#allocation4], %s260_s6  ;;  %s1440_s16 = scalar_lea.vmem (!%p1591_p12), [#allocation3], %s746_s10 }
  0x6a   : > { %1191 = dma.done.wait (%p1592_p1), %s261_s12, 512  }
  0x6b   : > { %1193 = vsyncadd (%p1592_p1), %s261_s12, 4294966784  ;;  %s269_s13 = sand.u32 1, %s1298_s24   ;;  %s747_s17 = sshll.u32 %s260_s6, 9 }
  0x6c   : > { %s270_s14 = scalar_lea.sflag [#allocation7], %s269_s13  ;;  %s1447_s9 = scalar_lea.vmem [#allocation6], %s747_s17 }
  0x6d   : > { %1195 = dma.done.wait (%p1592_p1), %s270_s14, 8192  }
  0x6e   : > { %1197 = vsyncadd (%p1592_p1), %s270_s14, 4294959104  ;;  %p1593_p7 = scmp.eq.s32.totalorder %s1298_s24, 0 }
  0x70   : > { %1199 = dma.done.wait (%p1593_p7), [#allocation7], 2048   ;;  %p1594_p8 = pmov %p1593_p7 }
  0x71   : > { %p749_p9 = scmp.ne.s32.totalorder %s1220_s21, 0 }
  0x72   : > { %1201 = vsyncadd (%p1594_p8), [#allocation7], 4294965248  ;;  %v750_v0 = vld [vmem:[%s1576_s2] ss:$0 sm:$0xff] (!%p749_p9) }
  0x73   : > { %309 = sbr.rel (%p749_p9) target bundleno = 122 (0x7a), region = 56  ;;  %317 = vst [vmem:[#allocation2] sm:$0xff] (!%p749_p9), %v750_v0 }
  0x7a PF: > { %v339_v1 = vld [vmem:[%s1447_s9 + $0x80] sm:$0xff]  ;;  %v340_v2 = vld [vmem:[%s1447_s9 + $0x88] sm:$0xff]  ;;  %v341_v12 = vld [vmem:[%s1447_s9 + $0x90] sm:$0xff]  ;;  %p751_p10 = scmp.ne.s32.totalorder %s1220_s21, 1 }
  0x7b   : > { %v371_v3 = vld [vmem:[%s1447_s9 + $0x180] sm:$0xff]  ;;  %v881_v4 = vpack.c.bf16 %v340_v2, %v339_v1  ;;  %v372_v5 = vld [vmem:[%s1447_s9 + $0x188] sm:$0xff]  ;;  %v342_v14 = vld [vmem:[%s1447_s9 + $0x98] sm:$0xff]  ;;  %vm1236_vm0 = vmmov (!%p751_p10), 0  }
  0x7c   : > { %v323_v6 = vld [vmem:[%s1447_s9] sm:$0xff]  ;;  %v324_v7 = vld [vmem:[%s1447_s9 + $0x8] sm:$0xff]  ;;  %v913_v8 = vpack.c.bf16 %v372_v5, %v371_v3  ;;  %v373_v15 = vld [vmem:[%s1447_s9 + $0x190] sm:$0xff]  ;;  %v885_v17 = vpack.c.bf16 %v342_v14, %v341_v12 }
  0x7d   : > { %v883_v9 = vpack.c.bf16 %v324_v7, %v323_v6  ;;  %v355_v10 = vld [vmem:[%s1447_s9 + $0x100] sm:$0xff]  ;;  %v356_v11 = vld [vmem:[%s1447_s9 + $0x108] sm:$0xff]  ;;  %882 = vmatprep.subr.bf16.mxu0 %v881_v4  ;;  %v374_v16 = vld [vmem:[%s1447_s9 + $0x198] sm:$0xff] }
  0x7e   : > { %v915_v13 = vpack.c.bf16 %v356_v11, %v355_v10  ;;  %914 = vmatprep.subr.bf16.mxu1 %v913_v8  ;;  %v917_v18 = vpack.c.bf16 %v374_v16, %v373_v15  ;;  %v325_v19 = vld [vmem:[%s1447_s9 + $0x10] sm:$0xff]  ;;  %v326_v20 = vld [vmem:[%s1447_s9 + $0x18] sm:$0xff]  ;;  %v343_v24 = vld [vmem:[%s1447_s9 + $0xa0] sm:$0xff] }
  0x7f   : > { %884 = vmatpush3.bf16.msra.mxu0 %v883_v9  ;;  %v357_v21 = vld [vmem:[%s1447_s9 + $0x110] sm:$0xff]  ;;  %v887_v22 = vpack.c.bf16 %v326_v20, %v325_v19  ;;  %v358_v23 = vld [vmem:[%s1447_s9 + $0x118] sm:$0xff]  ;;  %v344_v25 = vld [vmem:[%s1447_s9 + $0xa8] sm:$0xff] }
  0x80   : > { %916 = vmatpush3.bf16.msra.mxu1 %v915_v13  ;;  %886 = vmatprep.subr.bf16.mxu0 %v885_v17  ;;  %v919_v26 = vpack.c.bf16 %v358_v23, %v357_v21  ;;  %v889_v27 = vpack.c.bf16 %v344_v25, %v343_v24  ;;  %v375_v28 = vld [vmem:[%s1447_s9 + $0x1a0] sm:$0xff]  ;;  %v376_v29 = vld [vmem:[%s1447_s9 + $0x1a8] sm:$0xff]  ;;  %v345_v36 = vld [vmem:[%s1447_s9 + $0xb0] sm:$0xff] }
  0x81   : > { %918 = vmatprep.subr.bf16.mxu1 %v917_v18  ;;  %v327_v30 = vld [vmem:[%s1447_s9 + $0x20] sm:$0xff]  ;;  %v921_v31 = vpack.c.bf16 %v376_v29, %v375_v28  ;;  %v328_v32 = vld [vmem:[%s1447_s9 + $0x28] sm:$0xff]  ;;  %v346_v37 = vld [vmem:[%s1447_s9 + $0xb8] sm:$0xff] }
  0x82   : > { %v359_v33 = vld [vmem:[%s1447_s9 + $0x120] sm:$0xff]  ;;  %v360_v34 = vld [vmem:[%s1447_s9 + $0x128] sm:$0xff]  ;;  %v891_v35 = vpack.c.bf16 %v328_v32, %v327_v30  ;;  %v377_v38 = vld [vmem:[%s1447_s9 + $0x1b0] sm:$0xff]  ;;  %v893_v40 = vpack.c.bf16 %v346_v37, %v345_v36 }
  0x83   : > { %888 = vmatpush3.bf16.msra.mxu0 %v887_v22  ;;  %v923_v39 = vpack.c.bf16 %v360_v34, %v359_v33  ;;  %v378_v41 = vld [vmem:[%s1447_s9 + $0x1b8] sm:$0xff]  ;;  %v329_v42 = vld [vmem:[%s1447_s9 + $0x30] sm:$0xff]  ;;  %v347_v47 = vld [vmem:[%s1447_s9 + $0xc0] sm:$0xff] }
  0x84   : > { %920 = vmatpush3.bf16.msra.mxu1 %v919_v26  ;;  %890 = vmatprep.subr.bf16.mxu0 %v889_v27  ;;  %v330_v43 = vld [vmem:[%s1447_s9 + $0x38] sm:$0xff]  ;;  %v925_v44 = vpack.c.bf16 %v378_v41, %v377_v38  ;;  %v361_v45 = vld [vmem:[%s1447_s9 + $0x130] sm:$0xff]  ;;  %v348_v48 = vld [vmem:[%s1447_s9 + $0xc8] sm:$0xff] }
  0x85   : > { %922 = vmatprep.subr.bf16.mxu1 %v921_v31  ;;  %v362_v46 = vld [vmem:[%s1447_s9 + $0x138] sm:$0xff]  ;;  %v379_v49 = vld [vmem:[%s1447_s9 + $0x1c0] sm:$0xff]  ;;  %v380_v50 = vld [vmem:[%s1447_s9 + $0x1c8] sm:$0xff]  ;;  %v895_v51 = vpack.c.bf16 %v330_v43, %v329_v42  ;;  %v897_v53 = vpack.c.bf16 %v348_v48, %v347_v47 }
  0x86   : > { %v927_v52 = vpack.c.bf16 %v362_v46, %v361_v45  ;;  %v331_v54 = vld [vmem:[%s1447_s9 + $0x40] sm:$0xff]  ;;  %v332_v55 = vld [vmem:[%s1447_s9 + $0x48] sm:$0xff]  ;;  %v929_v57 = vpack.c.bf16 %v380_v50, %v379_v49  ;;  %v349_v59 = vld [vmem:[%s1447_s9 + $0xd0] sm:$0xff]  ;;  %v1235_v49 = vmov (!%p751_p10), 0.0|0.0  }
  0x87   : > { %892 = vmatpush3.bf16.msra.mxu0 %v891_v35  ;;  %v363_v56 = vld [vmem:[%s1447_s9 + $0x140] sm:$0xff]  ;;  %v364_v58 = vld [vmem:[%s1447_s9 + $0x148] sm:$0xff]  ;;  %v350_v60 = vld [vmem:[%s1447_s9 + $0xd8] sm:$0xff]  ;;  %v899_v63 = vpack.c.bf16 %v332_v55, %v331_v54 }
  0x88   : > { %924 = vmatpush3.bf16.msra.mxu1 %v923_v39  ;;  %894 = vmatprep.subr.bf16.mxu0 %v893_v40  ;;  %v381_v61 = vld [vmem:[%s1447_s9 + $0x1d0] sm:$0xff]  ;;  %v382_v62 = vld [vmem:[%s1447_s9 + $0x1d8] sm:$0xff]  ;;  %v931_v0 = vpack.c.bf16 %v364_v58, %v363_v56  ;;  %v901_v1 = vpack.c.bf16 %v350_v60, %v349_v59  ;;  %v351_v7 = vld [vmem:[%s1447_s9 + $0xe0] sm:$0xff] }
  0x89   : > { %926 = vmatprep.subr.bf16.mxu1 %v925_v44  ;;  %v333_v2 = vld [vmem:[%s1447_s9 + $0x50] sm:$0xff]  ;;  %v334_v3 = vld [vmem:[%s1447_s9 + $0x58] sm:$0xff]  ;;  %v933_v5 = vpack.c.bf16 %v382_v62, %v381_v61  ;;  %v352_v8 = vld [vmem:[%s1447_s9 + $0xe8] sm:$0xff] }
  0x8a   : > { %v365_v4 = vld [vmem:[%s1447_s9 + $0x150] sm:$0xff]  ;;  %v366_v6 = vld [vmem:[%s1447_s9 + $0x158] sm:$0xff]  ;;  %v383_v9 = vld [vmem:[%s1447_s9 + $0x1e0] sm:$0xff]  ;;  %v903_v11 = vpack.c.bf16 %v334_v3, %v333_v2  ;;  %v905_v15 = vpack.c.bf16 %v352_v8, %v351_v7 }
  0x8b   : > { %896 = vmatpush3.bf16.msra.mxu0 %v895_v51  ;;  %v384_v10 = vld [vmem:[%s1447_s9 + $0x1e8] sm:$0xff]  ;;  %v335_v12 = vld [vmem:[%s1447_s9 + $0x60] sm:$0xff]  ;;  %v935_v14 = vpack.c.bf16 %v366_v6, %v365_v4  ;;  %v322_v18 = vld [vmem:[%s1440_s16 + $0x18] sm:$0xff] }
  0x8c   : > { %928 = vmatpush3.bf16.msra.mxu1 %v927_v52  ;;  %898 = vmatprep.subr.bf16.mxu0 %v897_v53  ;;  %v336_v13 = vld [vmem:[%s1447_s9 + $0x68] sm:$0xff]  ;;  %v367_v16 = vld [vmem:[%s1447_s9 + $0x160] sm:$0xff]  ;;  %v937_v19 = vpack.c.bf16 %v384_v10, %v383_v9  ;;  %v353_v21 = vld [vmem:[%s1447_s9 + $0xf0] sm:$0xff]  ;;  %v1237_v52 = vmov (!%p751_p10), 0.0  }
  0x8d   : > { %930 = vmatprep.subr.bf16.mxu1 %v929_v57  ;;  %v320_v17 = vld [vmem:[%s1440_s16 + $0x8] sm:$0xff]  ;;  %v354_v22 = vld [vmem:[%s1447_s9 + $0xf8] sm:$0xff]  ;;  %v385_v23 = vld [vmem:[%s1447_s9 + $0x1f0] sm:$0xff]  ;;  %521 = vmatprep.mubr.f32.mxu1 %v322_v18  ;;  %v907_v25 = vpack.c.bf16 %v336_v13, %v335_v12 }
  0x8e   : > { %v368_v20 = vld [vmem:[%s1447_s9 + $0x168] sm:$0xff]  ;;  %451 = vmatprep.mubr.f32.mxu0 %v320_v17  ;;  %v386_v24 = vld [vmem:[%s1447_s9 + $0x1f8] sm:$0xff]  ;;  %v909_v27 = vpack.c.bf16 %v354_v22, %v353_v21  ;;  %v337_v28 = vld [vmem:[%s1447_s9 + $0x70] sm:$0xff] }
  0x8f   : > { %900 = vmatpush3.bf16.msra.mxu0 %v899_v63  ;;  %v939_v26 = vpack.c.bf16 %v368_v20, %v367_v16  ;;  %v338_v29 = vld [vmem:[%s1447_s9 + $0x78] sm:$0xff]  ;;  %v941_v30 = vpack.c.bf16 %v386_v24, %v385_v23  ;;  %v369_v31 = vld [vmem:[%s1447_s9 + $0x170] sm:$0xff]  ;;  %v319_v35 = vld [vmem:[%s1440_s16] sm:$0xff] }
  0x90   : > { %932 = vmatpush3.bf16.msra.mxu1 %v931_v0  ;;  %902 = vmatprep.subr.bf16.mxu0 %v901_v1  ;;  %v370_v32 = vld [vmem:[%s1447_s9 + $0x178] sm:$0xff]  ;;  %v911_v33 = vpack.c.bf16 %v338_v29, %v337_v28  ;;  %v321_v36 = vld [vmem:[%s1440_s16 + $0x10] sm:$0xff]  ;;  %v535_v46 = vld [vmem:[#allocation8] sm:$0xff] (!%p751_p10) }
  0x91   : > { %934 = vmatprep.subr.bf16.mxu1 %v933_v5  ;;  %v943_v34 = vpack.c.bf16 %v370_v32, %v369_v31  ;;  %v318_v43 = vld [vmem:[#allocation2] sm:$0xff]  ;;  %v536_v47 = vld [vmem:[#allocation8 + $0x8] sm:$0xff] (!%p751_p10)  ;;  %v537_v48 = vld [vmem:[#allocation8 + $0x10] sm:$0xff] (!%p751_p10) }
  0x92   : > { %v946_v50 = vpack.c.bf16 (!%p751_p10), %v536_v47, %v535_v46  ;;  %v538_v51 = vld [vmem:[#allocation8 + $0x18] sm:$0xff] (!%p751_p10)  ;;  %v539_v54 = vld [vmem:[#allocation8 + $0x20] sm:$0xff] (!%p751_p10)  ;;  %v540_v55 = vld [vmem:[#allocation8 + $0x28] sm:$0xff] (!%p751_p10) }
  0x93   : > { %904 = vmatpush3.bf16.msra.mxu0 %v903_v11  ;;  %v949_v53 = vpack.c.bf16 (!%p751_p10), %v538_v51, %v537_v48  ;;  %v952_v56 = vpack.c.bf16 (!%p751_p10), %v540_v55, %v539_v54  ;;  %v541_v57 = vld [vmem:[#allocation8 + $0x30] sm:$0xff] (!%p751_p10)  ;;  %v542_v58 = vld [vmem:[#allocation8 + $0x38] sm:$0xff] (!%p751_p10)  ;;  %v543_v60 = vld [vmem:[#allocation8 + $0x40] sm:$0xff] (!%p751_p10) }
  0x94   : > { %936 = vmatpush3.bf16.msra.mxu1 %v935_v14  ;;  %906 = vmatprep.subr.bf16.mxu0 %v905_v15  ;;  %v955_v59 = vpack.c.bf16 (!%p751_p10), %v542_v58, %v541_v57  ;;  %v544_v61 = vld [vmem:[#allocation8 + $0x48] sm:$0xff] (!%p751_p10)  ;;  %v545_v63 = vld [vmem:[#allocation8 + $0x50] sm:$0xff] (!%p751_p10)  ;;  %v546_v0 = vld [vmem:[#allocation8 + $0x58] sm:$0xff] (!%p751_p10) }
  0x95   : > { %938 = vmatprep.subr.bf16.mxu1 %v937_v19  ;;  %v958_v62 = vpack.c.bf16 (!%p751_p10), %v544_v61, %v543_v60  ;;  %v961_v1 = vpack.c.bf16 (!%p751_p10), %v546_v0, %v545_v63  ;;  %v547_v2 = vld [vmem:[#allocation8 + $0x60] sm:$0xff] (!%p751_p10)  ;;  %v548_v3 = vld [vmem:[#allocation8 + $0x68] sm:$0xff] (!%p751_p10)  ;;  %v549_v5 = vld [vmem:[#allocation8 + $0x70] sm:$0xff] (!%p751_p10) }
  0x96   : > { %v964_v4 = vpack.c.bf16 (!%p751_p10), %v548_v3, %v547_v2  ;;  %v550_v6 = vld [vmem:[#allocation8 + $0x78] sm:$0xff] (!%p751_p10) }
  0x97   : > { %908 = vmatpush3.bf16.msra.mxu0 %v907_v25  ;;  %v967_v7 = vpack.c.bf16 (!%p751_p10), %v550_v6, %v549_v5  ;;  %v752_v10 = vld [vmem:[%s1578_s4] ss:$0 sm:$0xff] (!%p751_p10) }
  0x98   : > { %940 = vmatpush3.bf16.msra.mxu1 %v939_v26  ;;  %910 = vmatprep.subr.bf16.mxu0 %v909_v27 }
  0x99   : > { %942 = vmatprep.subr.bf16.mxu1 %v941_v30 }
  0x9b   : > { %912 = vmatpush3.bf16.msra.mxu0 %v911_v33 }
  0x9c   : > { %944 = vmatpush3.bf16.msra.mxu1 %v943_v34  ;;  %945 = vmatprep.subr.bf16.mxu0 (!%p751_p10), %v1235_v49 }
  0x9e   : > { %452 = vmatmul.mubr.f32.vlgmr.msra.gmra.mrb[0].mxu0 %v319_v35 }
  0x9f   : > { %522 = vmatmul.mubr.f32.vlgmr.msra.gmra.mrb[0].mxu1 %v321_v36  ;;  %878 = vmatprep.mubr.msk.f32.mxu0 (!%p751_p10), %vm1236_vm0, %v1237_v52 }
  0xa0   : > { %947 = vmatpush3.bf16.msra.mxu0 (!%p751_p10), %v946_v50 }
  0xa1   : > { %948 = vmatprep.subr.bf16.mxu0 (!%p751_p10), %v1235_v49 }
  0xa4   : > { %950 = vmatpush3.bf16.msra.mxu0 (!%p751_p10), %v949_v53 }
  0xa5   : > { %951 = vmatprep.subr.bf16.mxu0 (!%p751_p10), %v1235_v49 }
  0xa8   : > { %953 = vmatpush3.bf16.msra.mxu0 (!%p751_p10), %v952_v56 }
  0xa9   : > { %954 = vmatprep.subr.bf16.mxu0 (!%p751_p10), %v1235_v49 }
  0xac   : > { %956 = vmatpush3.bf16.msra.mxu0 (!%p751_p10), %v955_v59 }
  0xad   : > { %957 = vmatprep.subr.bf16.mxu0 (!%p751_p10), %v1235_v49 }
  0xb0   : > { %959 = vmatpush3.bf16.msra.mxu0 (!%p751_p10), %v958_v62 }
  0xb1   : > { %960 = vmatprep.subr.bf16.mxu0 (!%p751_p10), %v1235_v49 }
  0xb4   : > { %962 = vmatpush3.bf16.msra.mxu0 (!%p751_p10), %v961_v1 }
  0xb5   : > { %963 = vmatprep.subr.bf16.mxu0 (!%p751_p10), %v1235_v49 }
  0xb8   : > { %965 = vmatpush3.bf16.msra.mxu0 (!%p751_p10), %v964_v4 }
  0xb9   : > { %966 = vmatprep.subr.bf16.mxu0 (!%p751_p10), %v1235_v49 }
  0xbc   : > { %968 = vmatpush3.bf16.msra.mxu0 (!%p751_p10), %v967_v7 }
 0x171   : > { %v791_v37 = vpop.f32.mrb[0].mxu0 }
 0x172   : > { %v826_v38 = vpop.f32.mrb[0].mxu1  ;;  %v792_v39 = vpop.f32.mrb[1].mxu0 }
 0x173   : > { %v793_v40 = vadd.f32 %v792_v39, %v791_v37  ;;  %v827_v41 = vpop.f32.mrb[1].mxu1 }
 0x174   : > { %v828_v42 = vadd.f32 %v827_v41, %v826_v38  ;;  %532 = sbr.rel (%p751_p10) target bundleno = 605 (0x25d), region = 60 }
 0x176   : > { %v524_v44 = vadd.f32 %v828_v42, %v793_v40 }
 0x178   : > { %v527_v45 = vadd.f32 %v524_v44, %v318_v43 }
 0x17a   : > { %528 = vst [vmem:[#allocation2] sm:$0xff] %v527_v45 }
 0x181   : > { %v533_v8 = vld [vmem:[#allocation2] sm:$0xff] }
 0x182   : > { %v534_v9 = vmax.f32 %v533_v8, 0.0 }
 0x184   : > { %879 = vmatmul.mubr.f32.vlgmr.msra.gmra.mrb[0].mxu0 %v534_v9 }
 0x257   : > { %v624_v11 = vpop.f32.mrb[0].mxu0 }
 0x258   : > { %v625_v12 = vadd.f32 %v752_v10, %v624_v11  ;;  %v880_v13 = vpop.f32.mrb[1].mxu0 }
 0x25a   : > { %v628_v14 = vmax.f32 %v625_v12, 0.0 }
 0x25c   : > { %629 = vst [vmem:[#allocation9] sm:$0xff] %v628_v14 }
 0x25d PF: > { %p995_p11 = scmp.eq.s32.totalorder %s1298_s24, 1  ;;  %s1238_s18 = smov [#allocation9]  }
 0x25e   : > { %s639_s7 = sshll.u32 %s1238_s18, 4  ;;  %s640_s7 = int_to_ptr.vmem [resolvable:$true] %s639_s7 }
 0x25f   : > { %s1140_s27 = scalar_lea.vmem %s640_s7, 128  ;;  %p1147_p0 = scmp.lt.s32.totalorder %s640_s7, %s640_s7 }
 0x260   : > { %p1141_p13 = scmp.ne.s32.totalorder %s640_s7, %s1140_s27  ;;  %p1148_p6 = scmp.lt.s32.totalorder %s1140_s27, %s1140_s27 }
 0x262   : > { %p1142_p2 = pnand %p1141_p13, %p995_p11  ;;  %p1149_p4 = por %p1148_p6, %p1147_p0 }
 0x264   : > { %p1143_p3 = pneg %p1142_p2 }
 0x266   : > { %p1150_p5 = pnand %p1149_p4, %p1143_p3 }
 0x268   : > { %1153 = shalt.err (!%p1150_p5)
}
 0x269   : > { %s1154_s29 = scalar_lea.hbm %s1579_s5, 128 }
 0x26a   : > { %p1155_p12 = scmp.ne.s32.totalorder %s1579_s5, %s1154_s29  ;;  %p1160_p8 = scmp.lt.u32.totalorder %s1154_s29, %s1579_s5 }
 0x26c   : > { %p1156_p1 = pnand %p1155_p12, %p995_p11 }
 0x26e   : > { %p1157_p7 = pneg %p1156_p1 }
 0x270   : > { %p1162_p9 = pnand %p1160_p8, %p1157_p7 }
 0x272   : > { %1165 = shalt.err (!%p1162_p9)
}
 0x273   : > { %978 = dma.vmem_to_hbm [thread:$0]  (%p995_p11), %s640_s7, 128, %s1579_s5, [#allocation5]  }
 0x274   : > { %1203 = dma.done.wait (%p995_p11), [#allocation5], 128  }
 0x275   : > { %1205 = vsyncadd (%p995_p11), [#allocation5], 4294967168 }
 0x276 PF: > { %s22_s23 = sadd.s32 1, %s1228_s23   ;;  %s1595_s18 = smov %s1212_s19 }
 0x277   : > { %p19_p10 = scmp.ge.s32.totalorder %s22_s23, 4   ;;  %s1596_s19 = smov %s1216_s20 }
 0x278   : > { %s1597_s20 = smov %s1357_s8  ;;  %s1598_s21 = smov %s1224_s22 }
 0x279   : > { %s1599_s22 = smov %s1601_s30  ;;  %21 = sbr.rel (!%p19_p10) target bundleno = 7 (0x7), region = 103 }
 0x280   :  { %652 = vsyncpa [#allocation4], 1 }
 0x281   :  { %654 = vsyncpa [#allocation4 + $0x1], 1 }
 0x282   :  { %655 = vsyncpa [#allocation7], 1 }
 0x283   :  { %657 = vsyncpa [#allocation7 + $0x1], 1 }
 0x284   :  { %658 = vsyncpa [#allocation5], 1 }
 0x285   :  { %660 = vsyncpa [#allocation5 + $0x1], 1 }

// kernel: tpu_custom_call.1
= control target key start
LH: loop header
LB: loop body
LE: loop exit
PB: predicated region body
PF: predicated region fallthrough
CT: control target
= control target key end

     0   :  { %10 = vsyncpa [#allocation4], 0  ;;  %s1574_s0 = inlined_call_operand.hbm [shape: f32[8,1024], index: 0, kind: input, shape index: {}]   ;;  %s1575_s1 = inlined_call_operand.hbm [shape: f32[1024,128], index: 1, kind: input, shape index: {}]   ;;  %s1576_s2 = inlined_call_operand.vmem [shape: f32[1,128], index: 2, kind: input, shape index: {}]   ;;  %s1577_s3 = inlined_call_operand.hbm [shape: f32[128,128], index: 3, kind: input, shape index: {}]   ;;  %s1578_s4 = inlined_call_operand.vmem [shape: f32[1,128], index: 4, kind: input, shape index: {}]   ;;  %s1579_s5 = inlined_call_operand.hbm [shape: f32[8,128], index: 5, kind: output, shape index: {}]  }
   0x1   :  { %12 = vsyncpa [#allocation4 + $0x1], 0 }
   0x2   :  { %13 = vsyncpa [#allocation7], 0 }
   0x3   :  { %15 = vsyncpa [#allocation7 + $0x1], 0 }
   0x4   :  { %16 = vsyncpa [#allocation5], 0  ;;  %s1269_s18 = smov 0   ;;  %s1271_s19 = smov 0  }
   0x5   :  { %s1273_s20 = smov 0   ;;  %s1275_s21 = smov 0  }
   0x6   :  { %s1277_s22 = smov 0   ;;  %s1279_s23 = smov 0  }
   0x7 LB: > { %s1298_s24 = sadd.s32 4294967295, %s1228_s23   ;;  %p56_p0 = scmp.ne.s32.totalorder %s1212_s19, %s1208_s18  ;;  %s1228_s23 = sphi %s1279_s23, %s22_s23   ;;  %s1224_s22 = sphi %s1277_s22, %s1599_s22   ;;  %s1220_s21 = sphi %s1275_s21, %s1598_s21   ;;  %s1216_s20 = sphi %s1273_s20, %s1597_s20   ;;  %s1212_s19 = sphi %s1271_s19, %s1596_s19   ;;  %s1208_s18 = sphi %s1269_s18, %s1595_s18  }
   0x8   : > { %p1580_p1 = scmp.eq.s32.totalorder %s1298_s24, 0  ;;  %p736_p2 = scmp.ge.s32.totalorder %s1228_s23, 1 }
   0x9   : > { %p182_p3 = scmp.lt.s32.totalorder %s1228_s23, 3  ;;  %s1230_s27 = smov [#allocation8]  }
   0xa   : > { %p1306_p4 = por %p1580_p1, %p56_p0  ;;  %s197_s28 = sshll.u32 %s1230_s27, 4  ;;  %s198_s28 = int_to_ptr.vmem [resolvable:$true] %s197_s28 }
   0xb   : > { %p1310_p5 = pnand %p736_p2, %p182_p3  ;;  %s31_s30 = sadd.s32 1, %s1224_s22 }
   0xc   : > { %s1585_s25 = scalar_select %p1306_p4, 1, 0 }
   0xd   : > { %s1586_s26 = scalar_select %p1310_p5, 1, 0 }
   0xe   : > { %p981_p6 = pneg %p1310_p5  ;;  %s1052_s8 = scalar_lea.hbm %s1577_s3, 2048 }
   0xf   : > { %p1053_p8 = scmp.ne.s32.totalorder %s1577_s3, %s1052_s8  ;;  %p1059_p12 = scmp.lt.u32.totalorder %s1052_s8, %s1577_s3 }
  0x10   : > { %p1318_p7 = pnand %p981_p6, %p1580_p1 }
  0x12   : > { %p1054_p9 = pneg %p1318_p7 }
  0x14   : > { %p1055_p10 = pnand %p1054_p9, %p1053_p8 }
  0x16   : > { %p1056_p11 = pneg %p1055_p10 }
  0x18   : > { %p1061_p13 = pnand %p1059_p12, %p1056_p11 }
  0x1a   : > { %1064 = shalt.err (!%p1061_p13)
}
  0x1b   : > { %s1065_s13 = scalar_lea.vmem %s198_s28, 2048  ;;  %p1073_p6 = scmp.lt.s32.totalorder %s198_s28, %s198_s28 }
  0x1c   : > { %p1066_p0 = scmp.ne.s32.totalorder %s198_s28, %s1065_s13  ;;  %p1074_p1 = scmp.lt.s32.totalorder %s1065_s13, %s1065_s13 }
  0x1e   : > { %p1068_p2 = pnand %p1066_p0, %p1054_p9  ;;  %p1075_p4 = por %p1074_p1, %p1073_p6 }
  0x20   : > { %p1069_p3 = pneg %p1068_p2 }
  0x22   : > { %p1076_p5 = pnand %p1075_p4, %p1069_p3 }
  0x24   : > { %1079 = shalt.err (!%p1076_p5)
}
  0x25   : > { %s1583_s14 = smov 128   ;;  %s1584_s15 = smov 8  }
  0x26   : > { %984 = dma.hbm_to_vmem [thread:$0]  (!%p1318_p7), %s1577_s3, 2048, %s198_s28, [#allocation7], %s1583_s14, %s1583_s14, %s1584_s15  }
  0x27   : > { %p32_p1 = scmp.ge.s32.totalorder %s31_s30, 2  ;;  %s43_s18 = sadd.s32 1, %s1216_s20 }
  0x28   : > { %p50_p4 = scmp.ne.s32.totalorder %s1216_s20, %s1212_s19  ;;  %p51_p5 = scmp.eq.s32.totalorder %s1228_s23, 0 }
  0x29   : > { %s1601_s30 = smov (%p32_p1, %s31_s30), 0  ;;  %p993_p9 = scmp.lt.s32.totalorder %s1228_s23, 2 }
  0x2a   : > { %p52_p8 = por %p51_p5, %p50_p4  ;;  %s39_s27 = ssub.s32 %s1224_s22, %s1601_s30 }
  0x2b   : > { %s1352_s6 = sand.u32 1, %s1216_s20   ;;  %p41_p10 = scmp.eq.s32.totalorder %s39_s27, 0 }
  0x2c   : > { %s739_s29 = sshll.u32 %s1352_s6, 5  ;;  %s757_s7 = sshll.u32 %s1224_s22, 9 }
  0x2d   : > { %s1357_s8 = scalar_select %p41_p10, %s1216_s20, %s43_s18  }
  0x2e   : > { %s1362_s10 = scalar_lea.hbm %s1574_s0, %s757_s7  ;;  %s218_s11 = scalar_lea.vmem [#allocation3], %s739_s29 }
  0x2f   : > { %s228_s12 = sshll.u32 %s218_s11, 4  ;;  %p1364_p7 = pnand %p993_p9, %p52_p8  ;;  %s1368_s12 = int_to_ptr.vmem [resolvable:$true] %s228_s12 }
  0x30   : > { %s742_s16 = sshll.u32 %s1352_s6, 9  ;;  %s215_s17 = scalar_lea.sflag [#allocation4], %s1352_s6 }
  0x31   : > { %s1080_s18 = scalar_lea.hbm %s1362_s10, 512  ;;  %p1082_p12 = pneg %p1364_p7 }
  0x32   : > { %p1081_p11 = scmp.ne.s32.totalorder %s1362_s10, %s1080_s18  ;;  %s1085_s7 = scalar_lea.hbm %s1574_s0, 1024 }
  0x33   : > { %p1086_p2 = scmp.lt.u32.totalorder %s1362_s10, %s1574_s0  ;;  %p1087_p3 = scmp.lt.u32.totalorder %s1085_s7, %s1080_s18 }
  0x34   : > { %p1083_p13 = pnand %p1082_p12, %p1081_p11  ;;  %p1089_p1 = scmp.lt.u32.totalorder %s1080_s18, %s1362_s10 }
  0x35   : > { %p1088_p6 = por %p1087_p3, %p1086_p2 }
  0x36   : > { %p1084_p0 = pneg %p1083_p13 }
  0x37   : > { %p1090_p4 = por %p1089_p1, %p1088_p6 }
  0x39   : > { %p1091_p5 = pnand %p1090_p4, %p1084_p0 }
  0x3b   : > { %1094 = shalt.err (!%p1091_p5)
}
  0x3c   : > { %s1095_s11 = scalar_lea.vmem %s1368_s12, 512  ;;  %s1233_s27 = smov [#allocation3]  }
  0x3d   : > { %p1096_p8 = scmp.ne.s32.totalorder %s1368_s12, %s1095_s11  ;;  %s1100_s29 = sshll.u32 %s1233_s27, 4  ;;  %s1101_s29 = int_to_ptr.vmem [resolvable:$false] %s1100_s29 }
  0x3e   : > { %s1102_s28 = scalar_lea.vmem %s1101_s29, 1024  ;;  %p1103_p11 = scmp.lt.s32.totalorder %s1368_s12, %s1101_s29 }
  0x3f   : > { %p1098_p9 = pnand %p1096_p8, %p1082_p12  ;;  %p1104_p13 = scmp.lt.s32.totalorder %s1102_s28, %s1095_s11 }
  0x41   : > { %p1099_p10 = pneg %p1098_p9  ;;  %p1105_p2 = por %p1104_p13, %p1103_p11 }
  0x43   : > { %p1106_p3 = pnand %p1105_p2, %p1099_p10 }
  0x45   : > { %1109 = shalt.err (!%p1106_p3)
}
  0x46   : > { %988 = dma.hbm_to_vmem [thread:$0]  (!%p1364_p7), %s1362_s10, 512, %s1368_s12, %s215_s17  }
  0x47   : > { %s758_s18 = sshll.u32 %s1224_s22, 13  ;;  %s239_s7 = scalar_lea.vmem [#allocation6], %s742_s16 }
  0x48   : > { %s246_s9 = sshll.u32 %s239_s7, 4  ;;  %s235_s27 = sand.u32 1, %s1228_s23   ;;  %s1400_s9 = int_to_ptr.vmem [resolvable:$true] %s246_s9 }
  0x49   : > { %s1406_s28 = scalar_lea.hbm %s1575_s1, %s758_s18  ;;  %s1408_s14 = scalar_lea.sflag [#allocation7], %s235_s27 }
  0x4a   : > { %s1110_s15 = scalar_lea.hbm %s1406_s28, 8192  ;;  %s1115_s12 = scalar_lea.hbm %s1575_s1, 16384 }
  0x4b   : > { %p1111_p0 = scmp.ne.s32.totalorder %s1406_s28, %s1110_s15  ;;  %p1116_p4 = scmp.lt.u32.totalorder %s1406_s28, %s1575_s1 }
  0x4c   : > { %p1117_p5 = scmp.lt.u32.totalorder %s1115_s12, %s1110_s15  ;;  %p1119_p9 = scmp.lt.u32.totalorder %s1110_s15, %s1406_s28 }
  0x4d   : > { %p1113_p6 = pnand %p1111_p0, %p1082_p12 }
  0x4e   : > { %p1118_p8 = por %p1117_p5, %p1116_p4 }
  0x4f   : > { %p1114_p1 = pneg %p1113_p6 }
  0x50   : > { %p1120_p10 = por %p1119_p9, %p1118_p8 }
  0x52   : > { %p1121_p11 = pnand %p1120_p10, %p1114_p1 }
  0x54   : > { %1124 = shalt.err (!%p1121_p11)
}
  0x55   : > { %s1125_s18 = scalar_lea.vmem %s1400_s9, 8192  ;;  %s1234_s7 = smov [#allocation6]  }
  0x56   : > { %p1126_p13 = scmp.ne.s32.totalorder %s1400_s9, %s1125_s18  ;;  %s1130_s27 = sshll.u32 %s1234_s7, 4  ;;  %s1131_s27 = int_to_ptr.vmem [resolvable:$false] %s1130_s27 }
  0x57   : > { %s1132_s11 = scalar_lea.vmem %s1131_s27, 16384  ;;  %p1133_p0 = scmp.lt.s32.totalorder %s1400_s9, %s1131_s27 }
  0x58   : > { %p1128_p2 = pnand %p1126_p13, %p1082_p12  ;;  %p1134_p6 = scmp.lt.s32.totalorder %s1132_s11, %s1125_s18 }
  0x5a   : > { %p1129_p3 = pneg %p1128_p2  ;;  %p1135_p4 = por %p1134_p6, %p1133_p0 }
  0x5c   : > { %p1136_p5 = pnand %p1135_p4, %p1129_p3 }
  0x5e   : > { %1139 = shalt.err (!%p1136_p5)
}
  0x5f   : > { %s1589_s15 = smov 8   ;;  %s1590_s29 = smov 128  }
  0x60   : > { %991 = dma.hbm_to_vmem [thread:$0]  (!%p1364_p7), %s1406_s28, 8192, %s1400_s9, %s1408_s14, %s1590_s29, %s1590_s29, %s1589_s15  }
  0x61   : > { %p1591_p12 = scmp.ne.s32.totalorder %s1586_s26, 0 }
  0x62   : > { %s260_s6 = sand.u32 (!%p1591_p12), 1, %s1212_s19   ;;  %p1592_p1 = scmp.ne.s32.totalorder (!%p1591_p12), %s1585_s25, 0 }
  0x63   : > { %258 = sbr.rel (%p1591_p12) target bundleno = 630 (0x276), region = 40  ;;  %s746_s10 = sshll.u32 (!%p1591_p12), %s260_s6, 5 }
  0x64   : > { %s261_s12 = scalar_lea.sflag (!%p1591_p12), [#allocation4], %s260_s6  ;;  %s1440_s16 = scalar_lea.vmem (!%p1591_p12), [#allocation3], %s746_s10 }
  0x6a   : > { %1191 = dma.done.wait (%p1592_p1), %s261_s12, 512  }
  0x6b   : > { %1193 = vsyncadd (%p1592_p1), %s261_s12, 4294966784  ;;  %s269_s13 = sand.u32 1, %s1298_s24   ;;  %s747_s17 = sshll.u32 %s260_s6, 9 }
  0x6c   : > { %s270_s14 = scalar_lea.sflag [#allocation7], %s269_s13  ;;  %s1447_s9 = scalar_lea.vmem [#allocation6], %s747_s17 }
  0x6d   : > { %1195 = dma.done.wait (%p1592_p1), %s270_s14, 8192  }
  0x6e   : > { %1197 = vsyncadd (%p1592_p1), %s270_s14, 4294959104  ;;  %p1593_p7 = scmp.eq.s32.totalorder %s1298_s24, 0 }
  0x70   : > { %1199 = dma.done.wait (%p1593_p7), [#allocation7], 2048   ;;  %p1594_p8 = pmov %p1593_p7 }
  0x71   : > { %p749_p9 = scmp.ne.s32.totalorder %s1220_s21, 0 }
  0x72   : > { %1201 = vsyncadd (%p1594_p8), [#allocation7], 4294965248  ;;  %v750_v0 = vld [vmem:[%s1576_s2] ss:$0 sm:$0xff] (!%p749_p9) }
  0x73   : > { %309 = sbr.rel (%p749_p9) target bundleno = 122 (0x7a), region = 56  ;;  %317 = vst [vmem:[#allocation2] sm:$0xff] (!%p749_p9), %v750_v0 }
  0x7a PF: > { %v339_v1 = vld [vmem:[%s1447_s9 + $0x80] sm:$0xff]  ;;  %v340_v2 = vld [vmem:[%s1447_s9 + $0x88] sm:$0xff]  ;;  %v341_v12 = vld [vmem:[%s1447_s9 + $0x90] sm:$0xff]  ;;  %p751_p10 = scmp.ne.s32.totalorder %s1220_s21, 1 }
  0x7b   : > { %v371_v3 = vld [vmem:[%s1447_s9 + $0x180] sm:$0xff]  ;;  %v881_v4 = vpack.c.bf16 %v340_v2, %v339_v1  ;;  %v372_v5 = vld [vmem:[%s1447_s9 + $0x188] sm:$0xff]  ;;  %v342_v14 = vld [vmem:[%s1447_s9 + $0x98] sm:$0xff]  ;;  %vm1236_vm0 = vmmov (!%p751_p10), 0  }
  0x7c   : > { %v323_v6 = vld [vmem:[%s1447_s9] sm:$0xff]  ;;  %v324_v7 = vld [vmem:[%s1447_s9 + $0x8] sm:$0xff]  ;;  %v913_v8 = vpack.c.bf16 %v372_v5, %v371_v3  ;;  %v373_v15 = vld [vmem:[%s1447_s9 + $0x190] sm:$0xff]  ;;  %v885_v17 = vpack.c.bf16 %v342_v14, %v341_v12 }
  0x7d   : > { %v883_v9 = vpack.c.bf16 %v324_v7, %v323_v6  ;;  %v355_v10 = vld [vmem:[%s1447_s9 + $0x100] sm:$0xff]  ;;  %v356_v11 = vld [vmem:[%s1447_s9 + $0x108] sm:$0xff]  ;;  %882 = vmatprep.subr.bf16.mxu0 %v881_v4  ;;  %v374_v16 = vld [vmem:[%s1447_s9 + $0x198] sm:$0xff] }
  0x7e   : > { %v915_v13 = vpack.c.bf16 %v356_v11, %v355_v10  ;;  %914 = vmatprep.subr.bf16.mxu1 %v913_v8  ;;  %v917_v18 = vpack.c.bf16 %v374_v16, %v373_v15  ;;  %v325_v19 = vld [vmem:[%s1447_s9 + $0x10] sm:$0xff]  ;;  %v326_v20 = vld [vmem:[%s1447_s9 + $0x18] sm:$0xff]  ;;  %v343_v24 = vld [vmem:[%s1447_s9 + $0xa0] sm:$0xff] }
  0x7f   : > { %884 = vmatpush3.bf16.msra.mxu0 %v883_v9  ;;  %v357_v21 = vld [vmem:[%s1447_s9 + $0x110] sm:$0xff]  ;;  %v887_v22 = vpack.c.bf16 %v326_v20, %v325_v19  ;;  %v358_v23 = vld [vmem:[%s1447_s9 + $0x118] sm:$0xff]  ;;  %v344_v25 = vld [vmem:[%s1447_s9 + $0xa8] sm:$0xff] }
  0x80   : > { %916 = vmatpush3.bf16.msra.mxu1 %v915_v13  ;;  %886 = vmatprep.subr.bf16.mxu0 %v885_v17  ;;  %v919_v26 = vpack.c.bf16 %v358_v23, %v357_v21  ;;  %v889_v27 = vpack.c.bf16 %v344_v25, %v343_v24  ;;  %v375_v28 = vld [vmem:[%s1447_s9 + $0x1a0] sm:$0xff]  ;;  %v376_v29 = vld [vmem:[%s1447_s9 + $0x1a8] sm:$0xff]  ;;  %v345_v36 = vld [vmem:[%s1447_s9 + $0xb0] sm:$0xff] }
  0x81   : > { %918 = vmatprep.subr.bf16.mxu1 %v917_v18  ;;  %v327_v30 = vld [vmem:[%s1447_s9 + $0x20] sm:$0xff]  ;;  %v921_v31 = vpack.c.bf16 %v376_v29, %v375_v28  ;;  %v328_v32 = vld [vmem:[%s1447_s9 + $0x28] sm:$0xff]  ;;  %v346_v37 = vld [vmem:[%s1447_s9 + $0xb8] sm:$0xff] }
  0x82   : > { %v359_v33 = vld [vmem:[%s1447_s9 + $0x120] sm:$0xff]  ;;  %v360_v34 = vld [vmem:[%s1447_s9 + $0x128] sm:$0xff]  ;;  %v891_v35 = vpack.c.bf16 %v328_v32, %v327_v30  ;;  %v377_v38 = vld [vmem:[%s1447_s9 + $0x1b0] sm:$0xff]  ;;  %v893_v40 = vpack.c.bf16 %v346_v37, %v345_v36 }
  0x83   : > { %888 = vmatpush3.bf16.msra.mxu0 %v887_v22  ;;  %v923_v39 = vpack.c.bf16 %v360_v34, %v359_v33  ;;  %v378_v41 = vld [vmem:[%s1447_s9 + $0x1b8] sm:$0xff]  ;;  %v329_v42 = vld [vmem:[%s1447_s9 + $0x30] sm:$0xff]  ;;  %v347_v47 = vld [vmem:[%s1447_s9 + $0xc0] sm:$0xff] }
  0x84   : > { %920 = vmatpush3.bf16.msra.mxu1 %v919_v26  ;;  %890 = vmatprep.subr.bf16.mxu0 %v889_v27  ;;  %v330_v43 = vld [vmem:[%s1447_s9 + $0x38] sm:$0xff]  ;;  %v925_v44 = vpack.c.bf16 %v378_v41, %v377_v38  ;;  %v361_v45 = vld [vmem:[%s1447_s9 + $0x130] sm:$0xff]  ;;  %v348_v48 = vld [vmem:[%s1447_s9 + $0xc8] sm:$0xff] }
  0x85   : > { %922 = vmatprep.subr.bf16.mxu1 %v921_v31  ;;  %v362_v46 = vld [vmem:[%s1447_s9 + $0x138] sm:$0xff]  ;;  %v379_v49 = vld [vmem:[%s1447_s9 + $0x1c0] sm:$0xff]  ;;  %v380_v50 = vld [vmem:[%s1447_s9 + $0x1c8] sm:$0xff]  ;;  %v895_v51 = vpack.c.bf16 %v330_v43, %v329_v42  ;;  %v897_v53 = vpack.c.bf16 %v348_v48, %v347_v47 }
  0x86   : > { %v927_v52 = vpack.c.bf16 %v362_v46, %v361_v45  ;;  %v331_v54 = vld [vmem:[%s1447_s9 + $0x40] sm:$0xff]  ;;  %v332_v55 = vld [vmem:[%s1447_s9 + $0x48] sm:$0xff]  ;;  %v929_v57 = vpack.c.bf16 %v380_v50, %v379_v49  ;;  %v349_v59 = vld [vmem:[%s1447_s9 + $0xd0] sm:$0xff]  ;;  %v1235_v49 = vmov (!%p751_p10), 0.0|0.0  }
  0x87   : > { %892 = vmatpush3.bf16.msra.mxu0 %v891_v35  ;;  %v363_v56 = vld [vmem:[%s1447_s9 + $0x140] sm:$0xff]  ;;  %v364_v58 = vld [vmem:[%s1447_s9 + $0x148] sm:$0xff]  ;;  %v350_v60 = vld [vmem:[%s1447_s9 + $0xd8] sm:$0xff]  ;;  %v899_v63 = vpack.c.bf16 %v332_v55, %v331_v54 }
  0x88   : > { %924 = vmatpush3.bf16.msra.mxu1 %v923_v39  ;;  %894 = vmatprep.subr.bf16.mxu0 %v893_v40  ;;  %v381_v61 = vld [vmem:[%s1447_s9 + $0x1d0] sm:$0xff]  ;;  %v382_v62 = vld [vmem:[%s1447_s9 + $0x1d8] sm:$0xff]  ;;  %v931_v0 = vpack.c.bf16 %v364_v58, %v363_v56  ;;  %v901_v1 = vpack.c.bf16 %v350_v60, %v349_v59  ;;  %v351_v7 = vld [vmem:[%s1447_s9 + $0xe0] sm:$0xff] }
  0x89   : > { %926 = vmatprep.subr.bf16.mxu1 %v925_v44  ;;  %v333_v2 = vld [vmem:[%s1447_s9 + $0x50] sm:$0xff]  ;;  %v334_v3 = vld [vmem:[%s1447_s9 + $0x58] sm:$0xff]  ;;  %v933_v5 = vpack.c.bf16 %v382_v62, %v381_v61  ;;  %v352_v8 = vld [vmem:[%s1447_s9 + $0xe8] sm:$0xff] }
  0x8a   : > { %v365_v4 = vld [vmem:[%s1447_s9 + $0x150] sm:$0xff]  ;;  %v366_v6 = vld [vmem:[%s1447_s9 + $0x158] sm:$0xff]  ;;  %v383_v9 = vld [vmem:[%s1447_s9 + $0x1e0] sm:$0xff]  ;;  %v903_v11 = vpack.c.bf16 %v334_v3, %v333_v2  ;;  %v905_v15 = vpack.c.bf16 %v352_v8, %v351_v7 }
  0x8b   : > { %896 = vmatpush3.bf16.msra.mxu0 %v895_v51  ;;  %v384_v10 = vld [vmem:[%s1447_s9 + $0x1e8] sm:$0xff]  ;;  %v335_v12 = vld [vmem:[%s1447_s9 + $0x60] sm:$0xff]  ;;  %v935_v14 = vpack.c.bf16 %v366_v6, %v365_v4  ;;  %v322_v18 = vld [vmem:[%s1440_s16 + $0x18] sm:$0xff] }
  0x8c   : > { %928 = vmatpush3.bf16.msra.mxu1 %v927_v52  ;;  %898 = vmatprep.subr.bf16.mxu0 %v897_v53  ;;  %v336_v13 = vld [vmem:[%s1447_s9 + $0x68] sm:$0xff]  ;;  %v367_v16 = vld [vmem:[%s1447_s9 + $0x160] sm:$0xff]  ;;  %v937_v19 = vpack.c.bf16 %v384_v10, %v383_v9  ;;  %v353_v21 = vld [vmem:[%s1447_s9 + $0xf0] sm:$0xff]  ;;  %v1237_v52 = vmov (!%p751_p10), 0.0  }
  0x8d   : > { %930 = vmatprep.subr.bf16.mxu1 %v929_v57  ;;  %v320_v17 = vld [vmem:[%s1440_s16 + $0x8] sm:$0xff]  ;;  %v354_v22 = vld [vmem:[%s1447_s9 + $0xf8] sm:$0xff]  ;;  %v385_v23 = vld [vmem:[%s1447_s9 + $0x1f0] sm:$0xff]  ;;  %521 = vmatprep.mubr.f32.mxu1 %v322_v18  ;;  %v907_v25 = vpack.c.bf16 %v336_v13, %v335_v12 }
  0x8e   : > { %v368_v20 = vld [vmem:[%s1447_s9 + $0x168] sm:$0xff]  ;;  %451 = vmatprep.mubr.f32.mxu0 %v320_v17  ;;  %v386_v24 = vld [vmem:[%s1447_s9 + $0x1f8] sm:$0xff]  ;;  %v909_v27 = vpack.c.bf16 %v354_v22, %v353_v21  ;;  %v337_v28 = vld [vmem:[%s1447_s9 + $0x70] sm:$0xff] }
  0x8f   : > { %900 = vmatpush3.bf16.msra.mxu0 %v899_v63  ;;  %v939_v26 = vpack.c.bf16 %v368_v20, %v367_v16  ;;  %v338_v29 = vld [vmem:[%s1447_s9 + $0x78] sm:$0xff]  ;;  %v941_v30 = vpack.c.bf16 %v386_v24, %v385_v23  ;;  %v369_v31 = vld [vmem:[%s1447_s9 + $0x170] sm:$0xff]  ;;  %v319_v35 = vld [vmem:[%s1440_s16] sm:$0xff] }
  0x90   : > { %932 = vmatpush3.bf16.msra.mxu1 %v931_v0  ;;  %902 = vmatprep.subr.bf16.mxu0 %v901_v1  ;;  %v370_v32 = vld [vmem:[%s1447_s9 + $0x178] sm:$0xff]  ;;  %v911_v33 = vpack.c.bf16 %v338_v29, %v337_v28  ;;  %v321_v36 = vld [vmem:[%s1440_s16 + $0x10] sm:$0xff]  ;;  %v535_v46 = vld [vmem:[#allocation8] sm:$0xff] (!%p751_p10) }
  0x91   : > { %934 = vmatprep.subr.bf16.mxu1 %v933_v5  ;;  %v943_v34 = vpack.c.bf16 %v370_v32, %v369_v31  ;;  %v318_v43 = vld [vmem:[#allocation2] sm:$0xff]  ;;  %v536_v47 = vld [vmem:[#allocation8 + $0x8] sm:$0xff] (!%p751_p10)  ;;  %v537_v48 = vld [vmem:[#allocation8 + $0x10] sm:$0xff] (!%p751_p10) }
  0x92   : > { %v946_v50 = vpack.c.bf16 (!%p751_p10), %v536_v47, %v535_v46  ;;  %v538_v51 = vld [vmem:[#allocation8 + $0x18] sm:$0xff] (!%p751_p10)  ;;  %v539_v54 = vld [vmem:[#allocation8 + $0x20] sm:$0xff] (!%p751_p10)  ;;  %v540_v55 = vld [vmem:[#allocation8 + $0x28] sm:$0xff] (!%p751_p10) }
  0x93   : > { %904 = vmatpush3.bf16.msra.mxu0 %v903_v11  ;;  %v949_v53 = vpack.c.bf16 (!%p751_p10), %v538_v51, %v537_v48  ;;  %v952_v56 = vpack.c.bf16 (!%p751_p10), %v540_v55, %v539_v54  ;;  %v541_v57 = vld [vmem:[#allocation8 + $0x30] sm:$0xff] (!%p751_p10)  ;;  %v542_v58 = vld [vmem:[#allocation8 + $0x38] sm:$0xff] (!%p751_p10)  ;;  %v543_v60 = vld [vmem:[#allocation8 + $0x40] sm:$0xff] (!%p751_p10) }
  0x94   : > { %936 = vmatpush3.bf16.msra.mxu1 %v935_v14  ;;  %906 = vmatprep.subr.bf16.mxu0 %v905_v15  ;;  %v955_v59 = vpack.c.bf16 (!%p751_p10), %v542_v58, %v541_v57  ;;  %v544_v61 = vld [vmem:[#allocation8 + $0x48] sm:$0xff] (!%p751_p10)  ;;  %v545_v63 = vld [vmem:[#allocation8 + $0x50] sm:$0xff] (!%p751_p10)  ;;  %v546_v0 = vld [vmem:[#allocation8 + $0x58] sm:$0xff] (!%p751_p10) }
  0x95   : > { %938 = vmatprep.subr.bf16.mxu1 %v937_v19  ;;  %v958_v62 = vpack.c.bf16 (!%p751_p10), %v544_v61, %v543_v60  ;;  %v961_v1 = vpack.c.bf16 (!%p751_p10), %v546_v0, %v545_v63  ;;  %v547_v2 = vld [vmem:[#allocation8 + $0x60] sm:$0xff] (!%p751_p10)  ;;  %v548_v3 = vld [vmem:[#allocation8 + $0x68] sm:$0xff] (!%p751_p10)  ;;  %v549_v5 = vld [vmem:[#allocation8 + $0x70] sm:$0xff] (!%p751_p10) }
  0x96   : > { %v964_v4 = vpack.c.bf16 (!%p751_p10), %v548_v3, %v547_v2  ;;  %v550_v6 = vld [vmem:[#allocation8 + $0x78] sm:$0xff] (!%p751_p10) }
  0x97   : > { %908 = vmatpush3.bf16.msra.mxu0 %v907_v25  ;;  %v967_v7 = vpack.c.bf16 (!%p751_p10), %v550_v6, %v549_v5  ;;  %v752_v10 = vld [vmem:[%s1578_s4] ss:$0 sm:$0xff] (!%p751_p10) }
  0x98   : > { %940 = vmatpush3.bf16.msra.mxu1 %v939_v26  ;;  %910 = vmatprep.subr.bf16.mxu0 %v909_v27 }
  0x99   : > { %942 = vmatprep.subr.bf16.mxu1 %v941_v30 }
  0x9b   : > { %912 = vmatpush3.bf16.msra.mxu0 %v911_v33 }
  0x9c   : > { %944 = vmatpush3.bf16.msra.mxu1 %v943_v34  ;;  %945 = vmatprep.subr.bf16.mxu0 (!%p751_p10), %v1235_v49 }
  0x9e   : > { %452 = vmatmul.mubr.f32.vlgmr.msra.gmra.mrb[0].mxu0 %v319_v35 }
  0x9f   : > { %522 = vmatmul.mubr.f32.vlgmr.msra.gmra.mrb[0].mxu1 %v321_v36  ;;  %878 = vmatprep.mubr.msk.f32.mxu0 (!%p751_p10), %vm1236_vm0, %v1237_v52 }
  0xa0   : > { %947 = vmatpush3.bf16.msra.mxu0 (!%p751_p10), %v946_v50 }
  0xa1   : > { %948 = vmatprep.subr.bf16.mxu0 (!%p751_p10), %v1235_v49 }
  0xa4   : > { %950 = vmatpush3.bf16.msra.mxu0 (!%p751_p10), %v949_v53 }
  0xa5   : > { %951 = vmatprep.subr.bf16.mxu0 (!%p751_p10), %v1235_v49 }
  0xa8   : > { %953 = vmatpush3.bf16.msra.mxu0 (!%p751_p10), %v952_v56 }
  0xa9   : > { %954 = vmatprep.subr.bf16.mxu0 (!%p751_p10), %v1235_v49 }
  0xac   : > { %956 = vmatpush3.bf16.msra.mxu0 (!%p751_p10), %v955_v59 }
  0xad   : > { %957 = vmatprep.subr.bf16.mxu0 (!%p751_p10), %v1235_v49 }
  0xb0   : > { %959 = vmatpush3.bf16.msra.mxu0 (!%p751_p10), %v958_v62 }
  0xb1   : > { %960 = vmatprep.subr.bf16.mxu0 (!%p751_p10), %v1235_v49 }
  0xb4   : > { %962 = vmatpush3.bf16.msra.mxu0 (!%p751_p10), %v961_v1 }
  0xb5   : > { %963 = vmatprep.subr.bf16.mxu0 (!%p751_p10), %v1235_v49 }
  0xb8   : > { %965 = vmatpush3.bf16.msra.mxu0 (!%p751_p10), %v964_v4 }
  0xb9   : > { %966 = vmatprep.subr.bf16.mxu0 (!%p751_p10), %v1235_v49 }
  0xbc   : > { %968 = vmatpush3.bf16.msra.mxu0 (!%p751_p10), %v967_v7 }
 0x171   : > { %v791_v37 = vpop.f32.mrb[0].mxu0 }
 0x172   : > { %v826_v38 = vpop.f32.mrb[0].mxu1  ;;  %v792_v39 = vpop.f32.mrb[1].mxu0 }
 0x173   : > { %v793_v40 = vadd.f32 %v792_v39, %v791_v37  ;;  %v827_v41 = vpop.f32.mrb[1].mxu1 }
 0x174   : > { %v828_v42 = vadd.f32 %v827_v41, %v826_v38  ;;  %532 = sbr.rel (%p751_p10) target bundleno = 605 (0x25d), region = 60 }
 0x176   : > { %v524_v44 = vadd.f32 %v828_v42, %v793_v40 }
 0x178   : > { %v527_v45 = vadd.f32 %v524_v44, %v318_v43 }
 0x17a   : > { %528 = vst [vmem:[#allocation2] sm:$0xff] %v527_v45 }
 0x181   : > { %v533_v8 = vld [vmem:[#allocation2] sm:$0xff] }
 0x182   : > { %v534_v9 = vmax.f32 %v533_v8, 0.0 }
 0x184   : > { %879 = vmatmul.mubr.f32.vlgmr.msra.gmra.mrb[0].mxu0 %v534_v9 }
 0x257   : > { %v624_v11 = vpop.f32.mrb[0].mxu0 }
 0x258   : > { %v625_v12 = vadd.f32 %v752_v10, %v624_v11  ;;  %v880_v13 = vpop.f32.mrb[1].mxu0 }
 0x25a   : > { %v628_v14 = vmax.f32 %v625_v12, 0.0 }
 0x25c   : > { %629 = vst [vmem:[#allocation9] sm:$0xff] %v628_v14 }
 0x25d PF: > { %p995_p11 = scmp.eq.s32.totalorder %s1298_s24, 1  ;;  %s1238_s18 = smov [#allocation9]  }
 0x25e   : > { %s639_s7 = sshll.u32 %s1238_s18, 4  ;;  %s640_s7 = int_to_ptr.vmem [resolvable:$true] %s639_s7 }
 0x25f   : > { %s1140_s27 = scalar_lea.vmem %s640_s7, 128  ;;  %p1147_p0 = scmp.lt.s32.totalorder %s640_s7, %s640_s7 }
 0x260   : > { %p1141_p13 = scmp.ne.s32.totalorder %s640_s7, %s1140_s27  ;;  %p1148_p6 = scmp.lt.s32.totalorder %s1140_s27, %s1140_s27 }
 0x262   : > { %p1142_p2 = pnand %p1141_p13, %p995_p11  ;;  %p1149_p4 = por %p1148_p6, %p1147_p0 }
 0x264   : > { %p1143_p3 = pneg %p1142_p2 }
 0x266   : > { %p1150_p5 = pnand %p1149_p4, %p1143_p3 }
 0x268   : > { %1153 = shalt.err (!%p1150_p5)
}
 0x269   : > { %s1154_s29 = scalar_lea.hbm %s1579_s5, 128 }
 0x26a   : > { %p1155_p12 = scmp.ne.s32.totalorder %s1579_s5, %s1154_s29  ;;  %p1160_p8 = scmp.lt.u32.totalorder %s1154_s29, %s1579_s5 }
 0x26c   : > { %p1156_p1 = pnand %p1155_p12, %p995_p11 }
 0x26e   : > { %p1157_p7 = pneg %p1156_p1 }
 0x270   : > { %p1162_p9 = pnand %p1160_p8, %p1157_p7 }
 0x272   : > { %1165 = shalt.err (!%p1162_p9)
}
 0x273   : > { %978 = dma.vmem_to_hbm [thread:$0]  (%p995_p11), %s640_s7, 128, %s1579_s5, [#allocation5]  }
 0x274   : > { %1203 = dma.done.wait (%p995_p11), [#allocation5], 128  }
 0x275   : > { %1205 = vsyncadd (%p995_p11), [#allocation5], 4294967168 }
 0x276 PF: > { %s22_s23 = sadd.s32 1, %s1228_s23   ;;  %s1595_s18 = smov %s1212_s19 }
 0x277   : > { %p19_p10 = scmp.ge.s32.totalorder %s22_s23, 4   ;;  %s1596_s19 = smov %s1216_s20 }
 0x278   : > { %s1597_s20 = smov %s1357_s8  ;;  %s1598_s21 = smov %s1224_s22 }
 0x279   : > { %s1599_s22 = smov %s1601_s30  ;;  %21 = sbr.rel (!%p19_p10) target bundleno = 7 (0x7), region = 103 }
 0x280   :  { %652 = vsyncpa [#allocation4], 1 }
 0x281   :  { %654 = vsyncpa [#allocation4 + $0x1], 1 }
 0x282   :  { %655 = vsyncpa [#allocation7], 1 }
 0x283   :  { %657 = vsyncpa [#allocation7 + $0x1], 1 }
 0x284   :  { %658 = vsyncpa [#allocation5], 1 }
 0x285   :  { %660 = vsyncpa [#allocation5 + $0x1], 1 }

</bundles_post_ra>
